<compile_context>
chip_gen: v7x
topology: tpu7x:2x2x1
jax: 0.10.0
libtpu: 0.0.40
codegen_flags: <defaults>
</compile_context>

<pallas_src>
import numpy as np
import jax
import jax.numpy as jnp
from jax.experimental import pallas as pl
from jax.experimental.pallas import tpu as pltpu

LATENT_DIM = 32       # latent_dim
OUT_FEATURES = 64     # out_features


# ----------------------------- Pallas kernel --------------------------------
def decoder_kernel(x_ref, w1_ref, b1_ref, w2_ref, b2_ref, w3_ref, b3_ref,
                   mx_ref, n2_ref, out_ref):
    f32 = jnp.float32

    # --- MLP stack: x @ W + b, ReLU ---
    h = jnp.dot(x_ref[...], w1_ref[...], preferred_element_type=f32) + b1_ref[...]
    h = jnp.maximum(h, 0.0)
    h = jnp.dot(h, w2_ref[...], preferred_element_type=f32) + b2_ref[...]
    h = jnp.maximum(h, 0.0)
    h3 = jnp.dot(h, w3_ref[...], preferred_element_type=f32) + b3_ref[...]
    h3 = jnp.maximum(h3, 0.0)
    # h3: (BM, 896). 7 groups of 128 lanes: [ix*16+ci (112) | const-1 @112 | 0-pad].

    mx_w = mx_ref[...]              # (128, 512): 4 aligned ky-tap groups (+ folded TCNN1 bias)
    n2a = n2_ref[0:128, :]          # (128, 128): TCNN2 -> final rows 4my, 4my+1 (from a0)
    n2b = n2_ref[128:256, :]        # (128, 128): TCNN2 -> final rows 4my+2, 4my+3 (from a1)

    def row_taps(iy):
        # All 4 kernel-row taps of TCNN1 for input image row iy.
        return jnp.dot(h3[:, iy * 128:(iy + 1) * 128], mx_w,
                       preferred_element_type=f32)

    # Rolling 3-row window over the taps (bounds live VMEM to 3 buffers).
    U_m1 = None                      # U[my-1]
    U_0 = row_taps(0)                # U[my]
    U_p1 = row_taps(1)               # U[my+1]
    for my in range(7):
        # TCNN1 output rows oy = 2*my (y0) and oy = 2*my+1 (y1):
        #   y0 = ky=1 tap of row my (+ ky=3 tap of row my-1)
        #   y1 = ky=2 tap of row my (+ ky=0 tap of row my+1)
        y0 = U_0[:, 128:256]
        if my >= 1:
            y0 = y0 + U_m1[:, 384:512]
        y1 = U_0[:, 256:384]
        if my <= 5:
            y1 = y1 + U_p1[:, 0:128]

        a0 = jnp.maximum(y0, 0.0)    # relu(TCNN1) row 2*my,   lanes (mx,px,co) + const-1 lane
        a1 = jnp.maximum(y1, 0.0)    # relu(TCNN1) row 2*my+1

        # TCNN2 + sigmoid: one aligned 128-lane tile per my (112 valid lanes,
        # already in final flattened row-major order; bias folded into n2a/n2b).
        z = jax.nn.sigmoid(jnp.dot(a0, n2a, preferred_element_type=f32)
                           + jnp.dot(a1, n2b, preferred_element_type=f32))
        out_ref[:, my * 128:(my + 1) * 128] = z

        # Slide the window.
        U_m1, U_0 = U_0, U_p1
        if my + 2 <= 6:
            U_p1 = row_taps(my + 2)


# ----------------------- Host-side operand construction ----------------------
def _mlp3_padded(w3, b3):
    """Permute MLP3 output columns (ci,iy,ix) -> (iy, ix*16+ci), pad each iy
    group to 128 lanes, and plant a constant-1 lane at offset 112 of each group
    (carries the conv biases through the ReLU)."""
    w3p = np.zeros((w3.shape[0], 7 * 128), np.float32)
    b3p = np.zeros((1, 7 * 128), np.float32)
    for iy in range(7):
        for ix in range(7):
            for ci in range(16):
                src = ci * 49 + iy * 7 + ix
                dst = iy * 128 + ix * 16 + ci
                w3p[:, dst] = w3[:, src]
                b3p[0, dst] = b3[src]
        b3p[0, iy * 128 + 112] = 1.0       # const-1 lane (relu(1) = 1)
    return w3p, b3p


def _tcnn1_row_matrix(wt1, bt1):
    """(128, 512) operand for ConvTranspose2d(16->8, k=4, s=2, p=1).

    Applied to one padded input-row group (lanes ix*16+ci, const-1 @112), it
    produces four aligned 128-lane tap groups: column = ky*128 + mx*16+px*8+co
    (output column ox = 2*mx + px; relation ox = 2*ix - 1 + kx).  The TCNN1
    bias is folded into the ky=1 / ky=2 groups via the constant-1 lane (those
    are the taps that exist for every output row), and the constant-1 lane is
    propagated to lane 112 of those groups for the TCNN2 bias.
    """
    m = np.zeros((128, 4 * 128), np.float32)
    for ky in range(4):
        base = ky * 128
        for mxi in range(7):
            for px in range(2):
                for co in range(8):
                    col = base + mxi * 16 + px * 8 + co
                    for ix in range(7):
                        for ci in range(16):
                            v = 0.0
                            if px == 0:
                                if ix == mxi:
                                    v += wt1[ci, co, ky, 1]
                                if ix == mxi - 1:
                                    v += wt1[ci, co, ky, 3]
                            else:
                                if ix == mxi:
                                    v += wt1[ci, co, ky, 2]
                                if ix == mxi + 1:
                                    v += wt1[ci, co, ky, 0]
                            m[ix * 16 + ci, col] = v
                    if ky in (1, 2):
                        m[112, col] = bt1[co]       # bias, added exactly once per output row
        if ky in (1, 2):
            m[112, base + 112] = 1.0                # propagate const-1 lane to a0 / a1
    return m


def _tcnn2_fused_matrix(wt2, bt2):
    """(256, 128) operand for ConvTranspose2d(8->1, k=2, s=2, p=0) (pixel shuffle),
    fused over the (a0, a1) row pair of one my:
      rows   0..127 : a0 lanes (mx,px,co | const-1 @112) -> output cols 0..55
      rows 128..255 : a1 lanes                           -> output cols 56..111
    Output columns are already in final flattened-image order within the my
    group; cols 112..127 are zero padding.  TCNN2 bias folded via the const-1
    lanes."""
    n2 = np.zeros((256, 128), np.float32)
    for row_off, col_off in ((0, 0), (128, 56)):
        for mxi in range(7):
            for px in range(2):
                for co in range(8):
                    row = row_off + mxi * 16 + px * 8 + co
                    for qy in range(2):
                        for qx in range(2):
                            n2[row, col_off + qy * 28 + 4 * mxi + 2 * px + qx] = wt2[co, 0, qy, qx]
        n2[row_off + 112, col_off:col_off + 56] = bt2[0]
    return n2


def build_kernel_params(p):
    w3 = np.asarray(p["w3"], np.float32)
    b3 = np.asarray(p["b3"], np.float32)
    wt1 = np.asarray(p["wt1"], np.float32)
    bt1 = np.asarray(p["bt1"], np.float32)
    wt2 = np.asarray(p["wt2"], np.float32)
    bt2 = np.asarray(p["bt2"], np.float32)

    w3p, b3p = _mlp3_padded(w3, b3)

    return dict(
        w1=jnp.asarray(p["w1"], jnp.float32),
        b1=jnp.asarray(p["b1"], jnp.float32).reshape(1, -1),
        w2=jnp.asarray(p["w2"], jnp.float32),
        b2=jnp.asarray(p["b2"], jnp.float32).reshape(1, -1),
        w3p=jnp.asarray(w3p),
        b3p=jnp.asarray(b3p),
        mx=jnp.asarray(_tcnn1_row_matrix(wt1, bt1)),
        n2=jnp.asarray(_tcnn2_fused_matrix(wt2, bt2)),
    )


# ------------------------------ Parameter init --------------------------------
def make_params(key):
    ks = jax.random.split(key, 10)

    def uinit(k, shape, fan_in):
        bound = 1.0 / np.sqrt(fan_in)
        return jax.random.uniform(k, shape, jnp.float32, -bound, bound)

    # Linear layers stored as (in, out) so forward is x @ W + b.
    w1 = uinit(ks[0], (LATENT_DIM, OUT_FEATURES), LATENT_DIM)
    b1 = uinit(ks[1], (OUT_FEATURES,), LATENT_DIM)
    w2 = uinit(ks[2], (OUT_FEATURES, 128), OUT_FEATURES)
    b2 = uinit(ks[3], (128,), OUT_FEATURES)
    w3 = uinit(ks[4], (128, 16 * 7 * 7), 128)
    b3 = uinit(ks[5], (16 * 7 * 7,), 128)

    # ConvTranspose2d weights (PyTorch layout: Cin, Cout, KH, KW).
    wt1 = uinit(ks[6], (16, 8, 4, 4), 8 * 4 * 4)
    bt1 = uinit(ks[7], (8,), 8 * 4 * 4)
    wt2 = uinit(ks[8], (8, 1, 2, 2), 1 * 2 * 2)
    bt2 = uinit(ks[9], (1,), 1 * 2 * 2)

    return dict(w1=w1, b1=b1, w2=w2, b2=b2, w3=w3, b3=b3,
                wt1=wt1, bt1=bt1, wt2=wt2, bt2=bt2)


# ------------------------------ Wrapper --------------------------------------
def _round_up(a, m):
    return (a + m - 1) // m * m


def decoder_forward(x, kp):
    B = x.shape[0]
    if B <= 8:
        BM = 8
    else:
        # >= 2 grid steps so the "parallel" batch axis can shard across v7x's
        # two TensorCores; cap at 256 so the per-step footprint (~6-7 MiB)
        # stays under v5e's 16 MiB default scoped VMEM.
        BM = min(256, _round_up((B + 1) // 2, 8))
    Bpad = _round_up(B, BM)
    x_p = jnp.zeros((Bpad, LATENT_DIM), jnp.float32).at[:B].set(x.astype(jnp.float32))

    weights = (kp["w1"], kp["b1"], kp["w2"], kp["b2"], kp["w3p"], kp["b3p"],
               kp["mx"], kp["n2"])

    x_spec = pl.BlockSpec((BM, LATENT_DIM), lambda i: (i, 0))
    w_specs = [pl.BlockSpec(tuple(w.shape), lambda i: (0, 0)) for w in weights]
    out_spec = pl.BlockSpec((BM, 7 * 128), lambda i: (i, 0))

    out_pad = pl.pallas_call(
        decoder_kernel,
        out_shape=jax.ShapeDtypeStruct((Bpad, 7 * 128), jnp.float32),
        grid=(Bpad // BM,),
        in_specs=[x_spec] + w_specs,
        out_specs=out_spec,
        compiler_params=pltpu.CompilerParams(
            dimension_semantics=("parallel",)),
    )(x_p, *weights)

    # Compact the padded (B, 7, 128) layout to the flat 784-pixel NCHW image.
    img = out_pad[:B].reshape(B, 7, 128)[:, :, :112].reshape(B, 1, 28, 28)
    return img


# --------------------------- Pure-JAX reference -------------------------------
def conv_transpose_ref(x, W, b, stride, padding):
    # x: (B, Cin, H, W); W: (Cin, Cout, KH, KW) — PyTorch ConvTranspose2d semantics.
    k = W.shape[2]
    Wk = jnp.flip(W, axis=(2, 3)).transpose(1, 0, 2, 3)  # (Cout, Cin, KH, KW)
    pad = k - 1 - padding
    out = jax.lax.conv_general_dilated(
        x, Wk, window_strides=(1, 1), padding=[(pad, pad), (pad, pad)],
        lhs_dilation=(stride, stride),
        dimension_numbers=("NCHW", "OIHW", "NCHW"))
    return out + b.reshape(1, -1, 1, 1)


def decoder_ref(x, p):
    h = jax.nn.relu(x @ p["w1"] + p["b1"])
    h = jax.nn.relu(h @ p["w2"] + p["b2"])
    h = jax.nn.relu(h @ p["w3"] + p["b3"])
    h = h.reshape(x.shape[0], 16, 7, 7)
    h = jax.nn.relu(conv_transpose_ref(h, p["wt1"], p["bt1"], 2, 1))
    h = jax.nn.sigmoid(conv_transpose_ref(h, p["wt2"], p["bt2"], 2, 0))
    return h


# ------------------------------ Main ------------------------------------------
if __name__ == "__main__":
    key = jax.random.PRNGKey(0)
    k_x, k_p = jax.random.split(key)
    params = make_params(k_p)
    kparams = build_kernel_params(params)

    B = 2
    x = jax.random.normal(k_x, (B, LATENT_DIM), jnp.float32)

    out = jax.block_until_ready(decoder_forward(x, kparams))
    ref = jax.block_until_ready(decoder_ref(x, params))

    assert out.shape == (B, 1, 28, 28), out.shape
    np.testing.assert_allclose(np.asarray(out), np.asarray(ref), rtol=1e-4, atol=1e-5)
    print("KERNEL_OK")
</pallas_src>

<mosaic_0001>
module attributes {stable_mosaic.version = 11 : i64} {
  func.func @decoder_kernel(%arg0: i32, %arg1: memref<8x32xf32, #tpu.memory_space<vmem>>, %arg2: memref<32x64xf32, #tpu.memory_space<vmem>>, %arg3: memref<1x64xf32, #tpu.memory_space<vmem>>, %arg4: memref<64x128xf32, #tpu.memory_space<vmem>>, %arg5: memref<1x128xf32, #tpu.memory_space<vmem>>, %arg6: memref<128x896xf32, #tpu.memory_space<vmem>>, %arg7: memref<1x896xf32, #tpu.memory_space<vmem>>, %arg8: memref<128x512xf32, #tpu.memory_space<vmem>>, %arg9: memref<256x128xf32, #tpu.memory_space<vmem>>, %arg10: memref<8x896xf32, #tpu.memory_space<vmem>>) attributes {dimension_semantics = [#tpu.dimension_semantics<parallel>], iteration_bounds = array<i64: 1>, scalar_prefetch = 0 : i64, scratch_operands = 0 : i64, tpu.core_type = #tpu.core_type<tc>, window_params = [{transform_indices = @transform_0, window_bounds = array<i64: 8, 32>}, {pipeline_mode = #tpu.pipeline_mode<synchronous>, transform_indices = @transform_1, window_bounds = array<i64: 32, 64>}, {pipeline_mode = #tpu.pipeline_mode<synchronous>, transform_indices = @transform_2, window_bounds = array<i64: 1, 64>}, {pipeline_mode = #tpu.pipeline_mode<synchronous>, transform_indices = @transform_3, window_bounds = array<i64: 64, 128>}, {pipeline_mode = #tpu.pipeline_mode<synchronous>, transform_indices = @transform_4, window_bounds = array<i64: 1, 128>}, {pipeline_mode = #tpu.pipeline_mode<synchronous>, transform_indices = @transform_5, window_bounds = array<i64: 128, 896>}, {pipeline_mode = #tpu.pipeline_mode<synchronous>, transform_indices = @transform_6, window_bounds = array<i64: 1, 896>}, {pipeline_mode = #tpu.pipeline_mode<synchronous>, transform_indices = @transform_7, window_bounds = array<i64: 128, 512>}, {pipeline_mode = #tpu.pipeline_mode<synchronous>, transform_indices = @transform_8, window_bounds = array<i64: 256, 128>}, {transform_indices = @transform_9, window_bounds = array<i64: 8, 896>}]} {
    %c0 = arith.constant 0 : index
    %c0_0 = arith.constant 0 : index
    %0 = vector.load %arg1[%c0, %c0_0] : memref<8x32xf32, #tpu.memory_space<vmem>>, vector<8x32xf32>
    %c0_1 = arith.constant 0 : index
    %c0_2 = arith.constant 0 : index
    %1 = vector.load %arg2[%c0_1, %c0_2] : memref<32x64xf32, #tpu.memory_space<vmem>>, vector<32x64xf32>
    %cst = arith.constant dense<0.000000e+00> : vector<8x64xf32>
    %2 = tpu.matmul %0, %1, %cst {dimension_numbers = #tpu.dot_dimension_numbers<[1], [0], [0], [1], [0, 0, 1, 1], [], []>} : vector<8x32xf32>, vector<32x64xf32>, vector<8x64xf32> -> vector<8x64xf32>
    %c0_3 = arith.constant 0 : index
    %c0_4 = arith.constant 0 : index
    %3 = vector.load %arg3[%c0_3, %c0_4] : memref<1x64xf32, #tpu.memory_space<vmem>>, vector<1x64xf32>
    %4 = vector.broadcast %3 : vector<1x64xf32> to vector<8x64xf32>
    %5 = arith.addf %2, %4 : vector<8x64xf32>
    %cst_5 = arith.constant 0.000000e+00 : f32
    %6 = vector.broadcast %cst_5 : f32 to vector<8x64xf32>
    %7 = arith.maximumf %5, %6 : vector<8x64xf32>
    %c0_6 = arith.constant 0 : index
    %c0_7 = arith.constant 0 : index
    %8 = vector.load %arg4[%c0_6, %c0_7] : memref<64x128xf32, #tpu.memory_space<vmem>>, vector<64x128xf32>
    %cst_8 = arith.constant dense<0.000000e+00> : vector<8x128xf32>
    %9 = tpu.matmul %7, %8, %cst_8 {dimension_numbers = #tpu.dot_dimension_numbers<[1], [0], [0], [1], [0, 0, 1, 1], [], []>} : vector<8x64xf32>, vector<64x128xf32>, vector<8x128xf32> -> vector<8x128xf32>
    %c0_9 = arith.constant 0 : index
    %c0_10 = arith.constant 0 : index
    %10 = vector.load %arg5[%c0_9, %c0_10] : memref<1x128xf32, #tpu.memory_space<vmem>>, vector<1x128xf32>
    %11 = vector.broadcast %10 : vector<1x128xf32> to vector<8x128xf32>
    %12 = arith.addf %9, %11 : vector<8x128xf32>
    %cst_11 = arith.constant 0.000000e+00 : f32
    %13 = vector.broadcast %cst_11 : f32 to vector<8x128xf32>
    %14 = arith.maximumf %12, %13 : vector<8x128xf32>
    %c0_12 = arith.constant 0 : index
    %c0_13 = arith.constant 0 : index
    %15 = vector.load %arg6[%c0_12, %c0_13] : memref<128x896xf32, #tpu.memory_space<vmem>>, vector<128x896xf32>
    %cst_14 = arith.constant dense<0.000000e+00> : vector<8x896xf32>
    %16 = tpu.matmul %14, %15, %cst_14 {dimension_numbers = #tpu.dot_dimension_numbers<[1], [0], [0], [1], [0, 0, 1, 1], [], []>} : vector<8x128xf32>, vector<128x896xf32>, vector<8x896xf32> -> vector<8x896xf32>
    %c0_15 = arith.constant 0 : index
    %c0_16 = arith.constant 0 : index
    %17 = vector.load %arg7[%c0_15, %c0_16] : memref<1x896xf32, #tpu.memory_space<vmem>>, vector<1x896xf32>
    %18 = vector.broadcast %17 : vector<1x896xf32> to vector<8x896xf32>
    %19 = arith.addf %16, %18 : vector<8x896xf32>
    %cst_17 = arith.constant 0.000000e+00 : f32
    %20 = vector.broadcast %cst_17 : f32 to vector<8x896xf32>
    %21 = arith.maximumf %19, %20 : vector<8x896xf32>
    %c0_18 = arith.constant 0 : index
    %c0_19 = arith.constant 0 : index
    %22 = vector.load %arg8[%c0_18, %c0_19] : memref<128x512xf32, #tpu.memory_space<vmem>>, vector<128x512xf32>
    %c0_20 = arith.constant 0 : index
    %c0_21 = arith.constant 0 : index
    %23 = vector.load %arg9[%c0_20, %c0_21] : memref<256x128xf32, #tpu.memory_space<vmem>>, vector<128x128xf32>
    %c128 = arith.constant 128 : index
    %c0_22 = arith.constant 0 : index
    %24 = vector.load %arg9[%c128, %c0_22] : memref<256x128xf32, #tpu.memory_space<vmem>>, vector<128x128xf32>
    %25 = vector.extract_strided_slice %21 {offsets = [0, 0], sizes = [8, 128], strides = [1, 1]} : vector<8x896xf32> to vector<8x128xf32>
    %cst_23 = arith.constant dense<0.000000e+00> : vector<8x512xf32>
    %26 = tpu.matmul %25, %22, %cst_23 {dimension_numbers = #tpu.dot_dimension_numbers<[1], [0], [0], [1], [0, 0, 1, 1], [], []>} : vector<8x128xf32>, vector<128x512xf32>, vector<8x512xf32> -> vector<8x512xf32>
    %27 = vector.extract_strided_slice %21 {offsets = [0, 128], sizes = [8, 128], strides = [1, 1]} : vector<8x896xf32> to vector<8x128xf32>
    %cst_24 = arith.constant dense<0.000000e+00> : vector<8x512xf32>
    %28 = tpu.matmul %27, %22, %cst_24 {dimension_numbers = #tpu.dot_dimension_numbers<[1], [0], [0], [1], [0, 0, 1, 1], [], []>} : vector<8x128xf32>, vector<128x512xf32>, vector<8x512xf32> -> vector<8x512xf32>
    %29 = vector.extract_strided_slice %26 {offsets = [0, 128], sizes = [8, 128], strides = [1, 1]} : vector<8x512xf32> to vector<8x128xf32>
    %30 = vector.extract_strided_slice %26 {offsets = [0, 256], sizes = [8, 128], strides = [1, 1]} : vector<8x512xf32> to vector<8x128xf32>
    %31 = vector.extract_strided_slice %28 {offsets = [0, 0], sizes = [8, 128], strides = [1, 1]} : vector<8x512xf32> to vector<8x128xf32>
    %32 = arith.addf %30, %31 : vector<8x128xf32>
    %cst_25 = arith.constant 0.000000e+00 : f32
    %33 = vector.broadcast %cst_25 : f32 to vector<8x128xf32>
    %34 = arith.maximumf %29, %33 : vector<8x128xf32>
    %cst_26 = arith.constant 0.000000e+00 : f32
    %35 = vector.broadcast %cst_26 : f32 to vector<8x128xf32>
    %36 = arith.maximumf %32, %35 : vector<8x128xf32>
    %cst_27 = arith.constant dense<0.000000e+00> : vector<8x128xf32>
    %37 = tpu.matmul %34, %23, %cst_27 {dimension_numbers = #tpu.dot_dimension_numbers<[1], [0], [0], [1], [0, 0, 1, 1], [], []>} : vector<8x128xf32>, vector<128x128xf32>, vector<8x128xf32> -> vector<8x128xf32>
    %cst_28 = arith.constant dense<0.000000e+00> : vector<8x128xf32>
    %38 = tpu.matmul %36, %24, %cst_28 {dimension_numbers = #tpu.dot_dimension_numbers<[1], [0], [0], [1], [0, 0, 1, 1], [], []>} : vector<8x128xf32>, vector<128x128xf32>, vector<8x128xf32> -> vector<8x128xf32>
    %39 = arith.addf %37, %38 : vector<8x128xf32>
    %40 = arith.negf %39 : vector<8x128xf32>
    %41 = math.exp %40 : vector<8x128xf32>
    %cst_29 = arith.constant 1.000000e+00 : f32
    %42 = vector.broadcast %cst_29 : f32 to vector<8x128xf32>
    %43 = arith.addf %42, %41 : vector<8x128xf32>
    %44 = arith.divf %42, %43 : vector<8x128xf32>
    %c0_30 = arith.constant 0 : index
    %c0_31 = arith.constant 0 : index
    %45 = vector.load %arg10[%c0_30, %c0_31] : memref<8x896xf32, #tpu.memory_space<vmem>>, vector<8x128xf32>
    tpu.vector_store %arg10[%c0_30, %c0_31], %44 {strides = array<i32>} : memref<8x896xf32, #tpu.memory_space<vmem>>, vector<8x128xf32>,
    %46 = vector.extract_strided_slice %21 {offsets = [0, 256], sizes = [8, 128], strides = [1, 1]} : vector<8x896xf32> to vector<8x128xf32>
    %cst_32 = arith.constant dense<0.000000e+00> : vector<8x512xf32>
    %47 = tpu.matmul %46, %22, %cst_32 {dimension_numbers = #tpu.dot_dimension_numbers<[1], [0], [0], [1], [0, 0, 1, 1], [], []>} : vector<8x128xf32>, vector<128x512xf32>, vector<8x512xf32> -> vector<8x512xf32>
    %48 = vector.extract_strided_slice %28 {offsets = [0, 128], sizes = [8, 128], strides = [1, 1]} : vector<8x512xf32> to vector<8x128xf32>
    %49 = vector.extract_strided_slice %26 {offsets = [0, 384], sizes = [8, 128], strides = [1, 1]} : vector<8x512xf32> to vector<8x128xf32>
    %50 = arith.addf %48, %49 : vector<8x128xf32>
    %51 = vector.extract_strided_slice %28 {offsets = [0, 256], sizes = [8, 128], strides = [1, 1]} : vector<8x512xf32> to vector<8x128xf32>
    %52 = vector.extract_strided_slice %47 {offsets = [0, 0], sizes = [8, 128], strides = [1, 1]} : vector<8x512xf32> to vector<8x128xf32>
    %53 = arith.addf %51, %52 : vector<8x128xf32>
    %cst_33 = arith.constant 0.000000e+00 : f32
    %54 = vector.broadcast %cst_33 : f32 to vector<8x128xf32>
    %55 = arith.maximumf %50, %54 : vector<8x128xf32>
    %cst_34 = arith.constant 0.000000e+00 : f32
    %56 = vector.broadcast %cst_34 : f32 to vector<8x128xf32>
    %57 = arith.maximumf %53, %56 : vector<8x128xf32>
    %cst_35 = arith.constant dense<0.000000e+00> : vector<8x128xf32>
    %58 = tpu.matmul %55, %23, %cst_35 {dimension_numbers = #tpu.dot_dimension_numbers<[1], [0], [0], [1], [0, 0, 1, 1], [], []>} : vector<8x128xf32>, vector<128x128xf32>, vector<8x128xf32> -> vector<8x128xf32>
    %cst_36 = arith.constant dense<0.000000e+00> : vector<8x128xf32>
    %59 = tpu.matmul %57, %24, %cst_36 {dimension_numbers = #tpu.dot_dimension_numbers<[1], [0], [0], [1], [0, 0, 1, 1], [], []>} : vector<8x128xf32>, vector<128x128xf32>, vector<8x128xf32> -> vector<8x128xf32>
    %60 = arith.addf %58, %59 : vector<8x128xf32>
    %61 = arith.negf %60 : vector<8x128xf32>
    %62 = math.exp %61 : vector<8x128xf32>
    %cst_37 = arith.constant 1.000000e+00 : f32
    %63 = vector.broadcast %cst_37 : f32 to vector<8x128xf32>
    %64 = arith.addf %63, %62 : vector<8x128xf32>
    %65 = arith.divf %63, %64 : vector<8x128xf32>
    %c0_38 = arith.constant 0 : index
    %c128_39 = arith.constant 128 : index
    %66 = vector.load %arg10[%c0_38, %c128_39] : memref<8x896xf32, #tpu.memory_space<vmem>>, vector<8x128xf32>
    tpu.vector_store %arg10[%c0_38, %c128_39], %65 {strides = array<i32>} : memref<8x896xf32, #tpu.memory_space<vmem>>, vector<8x128xf32>,
    %67 = vector.extract_strided_slice %21 {offsets = [0, 384], sizes = [8, 128], strides = [1, 1]} : vector<8x896xf32> to vector<8x128xf32>
    %cst_40 = arith.constant dense<0.000000e+00> : vector<8x512xf32>
    %68 = tpu.matmul %67, %22, %cst_40 {dimension_numbers = #tpu.dot_dimension_numbers<[1], [0], [0], [1], [0, 0, 1, 1], [], []>} : vector<8x128xf32>, vector<128x512xf32>, vector<8x512xf32> -> vector<8x512xf32>
    %69 = vector.extract_strided_slice %47 {offsets = [0, 128], sizes = [8, 128], strides = [1, 1]} : vector<8x512xf32> to vector<8x128xf32>
    %70 = vector.extract_strided_slice %28 {offsets = [0, 384], sizes = [8, 128], strides = [1, 1]} : vector<8x512xf32> to vector<8x128xf32>
    %71 = arith.addf %69, %70 : vector<8x128xf32>
    %72 = vector.extract_strided_slice %47 {offsets = [0, 256], sizes = [8, 128], strides = [1, 1]} : vector<8x512xf32> to vector<8x128xf32>
    %73 = vector.extract_strided_slice %68 {offsets = [0, 0], sizes = [8, 128], strides = [1, 1]} : vector<8x512xf32> to vector<8x128xf32>
    %74 = arith.addf %72, %73 : vector<8x128xf32>
    %cst_41 = arith.constant 0.000000e+00 : f32
    %75 = vector.broadcast %cst_41 : f32 to vector<8x128xf32>
    %76 = arith.maximumf %71, %75 : vector<8x128xf32>
    %cst_42 = arith.constant 0.000000e+00 : f32
    %77 = vector.broadcast %cst_42 : f32 to vector<8x128xf32>
    %78 = arith.maximumf %74, %77 : vector<8x128xf32>
    %cst_43 = arith.constant dense<0.000000e+00> : vector<8x128xf32>
    %79 = tpu.matmul %76, %23, %cst_43 {dimension_numbers = #tpu.dot_dimension_numbers<[1], [0], [0], [1], [0, 0, 1, 1], [], []>} : vector<8x128xf32>, vector<128x128xf32>, vector<8x128xf32> -> vector<8x128xf32>
    %cst_44 = arith.constant dense<0.000000e+00> : vector<8x128xf32>
    %80 = tpu.matmul %78, %24, %cst_44 {dimension_numbers = #tpu.dot_dimension_numbers<[1], [0], [0], [1], [0, 0, 1, 1], [], []>} : vector<8x128xf32>, vector<128x128xf32>, vector<8x128xf32> -> vector<8x128xf32>
    %81 = arith.addf %79, %80 : vector<8x128xf32>
    %82 = arith.negf %81 : vector<8x128xf32>
    %83 = math.exp %82 : vector<8x128xf32>
    %cst_45 = arith.constant 1.000000e+00 : f32
    %84 = vector.broadcast %cst_45 : f32 to vector<8x128xf32>
    %85 = arith.addf %84, %83 : vector<8x128xf32>
    %86 = arith.divf %84, %85 : vector<8x128xf32>
    %c0_46 = arith.constant 0 : index
    %c256 = arith.constant 256 : index
    %87 = vector.load %arg10[%c0_46, %c256] : memref<8x896xf32, #tpu.memory_space<vmem>>, vector<8x128xf32>
    tpu.vector_store %arg10[%c0_46, %c256], %86 {strides = array<i32>} : memref<8x896xf32, #tpu.memory_space<vmem>>, vector<8x128xf32>,
    %88 = vector.extract_strided_slice %21 {offsets = [0, 512], sizes = [8, 128], strides = [1, 1]} : vector<8x896xf32> to vector<8x128xf32>
    %cst_47 = arith.constant dense<0.000000e+00> : vector<8x512xf32>
    %89 = tpu.matmul %88, %22, %cst_47 {dimension_numbers = #tpu.dot_dimension_numbers<[1], [0], [0], [1], [0, 0, 1, 1], [], []>} : vector<8x128xf32>, vector<128x512xf32>, vector<8x512xf32> -> vector<8x512xf32>
    %90 = vector.extract_strided_slice %68 {offsets = [0, 128], sizes = [8, 128], strides = [1, 1]} : vector<8x512xf32> to vector<8x128xf32>
    %91 = vector.extract_strided_slice %47 {offsets = [0, 384], sizes = [8, 128], strides = [1, 1]} : vector<8x512xf32> to vector<8x128xf32>
    %92 = arith.addf %90, %91 : vector<8x128xf32>
    %93 = vector.extract_strided_slice %68 {offsets = [0, 256], sizes = [8, 128], strides = [1, 1]} : vector<8x512xf32> to vector<8x128xf32>
    %94 = vector.extract_strided_slice %89 {offsets = [0, 0], sizes = [8, 128], strides = [1, 1]} : vector<8x512xf32> to vector<8x128xf32>
    %95 = arith.addf %93, %94 : vector<8x128xf32>
    %cst_48 = arith.constant 0.000000e+00 : f32
    %96 = vector.broadcast %cst_48 : f32 to vector<8x128xf32>
    %97 = arith.maximumf %92, %96 : vector<8x128xf32>
    %cst_49 = arith.constant 0.000000e+00 : f32
    %98 = vector.broadcast %cst_49 : f32 to vector<8x128xf32>
    %99 = arith.maximumf %95, %98 : vector<8x128xf32>
    %cst_50 = arith.constant dense<0.000000e+00> : vector<8x128xf32>
    %100 = tpu.matmul %97, %23, %cst_50 {dimension_numbers = #tpu.dot_dimension_numbers<[1], [0], [0], [1], [0, 0, 1, 1], [], []>} : vector<8x128xf32>, vector<128x128xf32>, vector<8x128xf32> -> vector<8x128xf32>
    %cst_51 = arith.constant dense<0.000000e+00> : vector<8x128xf32>
    %101 = tpu.matmul %99, %24, %cst_51 {dimension_numbers = #tpu.dot_dimension_numbers<[1], [0], [0], [1], [0, 0, 1, 1], [], []>} : vector<8x128xf32>, vector<128x128xf32>, vector<8x128xf32> -> vector<8x128xf32>
    %102 = arith.addf %100, %101 : vector<8x128xf32>
    %103 = arith.negf %102 : vector<8x128xf32>
    %104 = math.exp %103 : vector<8x128xf32>
    %cst_52 = arith.constant 1.000000e+00 : f32
    %105 = vector.broadcast %cst_52 : f32 to vector<8x128xf32>
    %106 = arith.addf %105, %104 : vector<8x128xf32>
    %107 = arith.divf %105, %106 : vector<8x128xf32>
    %c0_53 = arith.constant 0 : index
    %c384 = arith.constant 384 : index
    %108 = vector.load %arg10[%c0_53, %c384] : memref<8x896xf32, #tpu.memory_space<vmem>>, vector<8x128xf32>
    tpu.vector_store %arg10[%c0_53, %c384], %107 {strides = array<i32>} : memref<8x896xf32, #tpu.memory_space<vmem>>, vector<8x128xf32>,
    %109 = vector.extract_strided_slice %21 {offsets = [0, 640], sizes = [8, 128], strides = [1, 1]} : vector<8x896xf32> to vector<8x128xf32>
    %cst_54 = arith.constant dense<0.000000e+00> : vector<8x512xf32>
    %110 = tpu.matmul %109, %22, %cst_54 {dimension_numbers = #tpu.dot_dimension_numbers<[1], [0], [0], [1], [0, 0, 1, 1], [], []>} : vector<8x128xf32>, vector<128x512xf32>, vector<8x512xf32> -> vector<8x512xf32>
    %111 = vector.extract_strided_slice %89 {offsets = [0, 128], sizes = [8, 128], strides = [1, 1]} : vector<8x512xf32> to vector<8x128xf32>
    %112 = vector.extract_strided_slice %68 {offsets = [0, 384], sizes = [8, 128], strides = [1, 1]} : vector<8x512xf32> to vector<8x128xf32>
    %113 = arith.addf %111, %112 : vector<8x128xf32>
    %114 = vector.extract_strided_slice %89 {offsets = [0, 256], sizes = [8, 128], strides = [1, 1]} : vector<8x512xf32> to vector<8x128xf32>
    %115 = vector.extract_strided_slice %110 {offsets = [0, 0], sizes = [8, 128], strides = [1, 1]} : vector<8x512xf32> to vector<8x128xf32>
    %116 = arith.addf %114, %115 : vector<8x128xf32>
    %cst_55 = arith.constant 0.000000e+00 : f32
    %117 = vector.broadcast %cst_55 : f32 to vector<8x128xf32>
    %118 = arith.maximumf %113, %117 : vector<8x128xf32>
    %cst_56 = arith.constant 0.000000e+00 : f32
    %119 = vector.broadcast %cst_56 : f32 to vector<8x128xf32>
    %120 = arith.maximumf %116, %119 : vector<8x128xf32>
    %cst_57 = arith.constant dense<0.000000e+00> : vector<8x128xf32>
    %121 = tpu.matmul %118, %23, %cst_57 {dimension_numbers = #tpu.dot_dimension_numbers<[1], [0], [0], [1], [0, 0, 1, 1], [], []>} : vector<8x128xf32>, vector<128x128xf32>, vector<8x128xf32> -> vector<8x128xf32>
    %cst_58 = arith.constant dense<0.000000e+00> : vector<8x128xf32>
    %122 = tpu.matmul %120, %24, %cst_58 {dimension_numbers = #tpu.dot_dimension_numbers<[1], [0], [0], [1], [0, 0, 1, 1], [], []>} : vector<8x128xf32>, vector<128x128xf32>, vector<8x128xf32> -> vector<8x128xf32>
    %123 = arith.addf %121, %122 : vector<8x128xf32>
    %124 = arith.negf %123 : vector<8x128xf32>
    %125 = math.exp %124 : vector<8x128xf32>
    %cst_59 = arith.constant 1.000000e+00 : f32
    %126 = vector.broadcast %cst_59 : f32 to vector<8x128xf32>
    %127 = arith.addf %126, %125 : vector<8x128xf32>
    %128 = arith.divf %126, %127 : vector<8x128xf32>
    %c0_60 = arith.constant 0 : index
    %c512 = arith.constant 512 : index
    %129 = vector.load %arg10[%c0_60, %c512] : memref<8x896xf32, #tpu.memory_space<vmem>>, vector<8x128xf32>
    tpu.vector_store %arg10[%c0_60, %c512], %128 {strides = array<i32>} : memref<8x896xf32, #tpu.memory_space<vmem>>, vector<8x128xf32>,
    %130 = vector.extract_strided_slice %21 {offsets = [0, 768], sizes = [8, 128], strides = [1, 1]} : vector<8x896xf32> to vector<8x128xf32>
    %cst_61 = arith.constant dense<0.000000e+00> : vector<8x512xf32>
    %131 = tpu.matmul %130, %22, %cst_61 {dimension_numbers = #tpu.dot_dimension_numbers<[1], [0], [0], [1], [0, 0, 1, 1], [], []>} : vector<8x128xf32>, vector<128x512xf32>, vector<8x512xf32> -> vector<8x512xf32>
    %132 = vector.extract_strided_slice %110 {offsets = [0, 128], sizes = [8, 128], strides = [1, 1]} : vector<8x512xf32> to vector<8x128xf32>
    %133 = vector.extract_strided_slice %89 {offsets = [0, 384], sizes = [8, 128], strides = [1, 1]} : vector<8x512xf32> to vector<8x128xf32>
    %134 = arith.addf %132, %133 : vector<8x128xf32>
    %135 = vector.extract_strided_slice %110 {offsets = [0, 256], sizes = [8, 128], strides = [1, 1]} : vector<8x512xf32> to vector<8x128xf32>
    %136 = vector.extract_strided_slice %131 {offsets = [0, 0], sizes = [8, 128], strides = [1, 1]} : vector<8x512xf32> to vector<8x128xf32>
    %137 = arith.addf %135, %136 : vector<8x128xf32>
    %cst_62 = arith.constant 0.000000e+00 : f32
    %138 = vector.broadcast %cst_62 : f32 to vector<8x128xf32>
    %139 = arith.maximumf %134, %138 : vector<8x128xf32>
    %cst_63 = arith.constant 0.000000e+00 : f32
    %140 = vector.broadcast %cst_63 : f32 to vector<8x128xf32>
    %141 = arith.maximumf %137, %140 : vector<8x128xf32>
    %cst_64 = arith.constant dense<0.000000e+00> : vector<8x128xf32>
    %142 = tpu.matmul %139, %23, %cst_64 {dimension_numbers = #tpu.dot_dimension_numbers<[1], [0], [0], [1], [0, 0, 1, 1], [], []>} : vector<8x128xf32>, vector<128x128xf32>, vector<8x128xf32> -> vector<8x128xf32>
    %cst_65 = arith.constant dense<0.000000e+00> : vector<8x128xf32>
    %143 = tpu.matmul %141, %24, %cst_65 {dimension_numbers = #tpu.dot_dimension_numbers<[1], [0], [0], [1], [0, 0, 1, 1], [], []>} : vector<8x128xf32>, vector<128x128xf32>, vector<8x128xf32> -> vector<8x128xf32>
    %144 = arith.addf %142, %143 : vector<8x128xf32>
    %145 = arith.negf %144 : vector<8x128xf32>
    %146 = math.exp %145 : vector<8x128xf32>
    %cst_66 = arith.constant 1.000000e+00 : f32
    %147 = vector.broadcast %cst_66 : f32 to vector<8x128xf32>
    %148 = arith.addf %147, %146 : vector<8x128xf32>
    %149 = arith.divf %147, %148 : vector<8x128xf32>
    %c0_67 = arith.constant 0 : index
    %c640 = arith.constant 640 : index
    %150 = vector.load %arg10[%c0_67, %c640] : memref<8x896xf32, #tpu.memory_space<vmem>>, vector<8x128xf32>
    tpu.vector_store %arg10[%c0_67, %c640], %149 {strides = array<i32>} : memref<8x896xf32, #tpu.memory_space<vmem>>, vector<8x128xf32>,
    %151 = vector.extract_strided_slice %131 {offsets = [0, 128], sizes = [8, 128], strides = [1, 1]} : vector<8x512xf32> to vector<8x128xf32>
    %152 = vector.extract_strided_slice %110 {offsets = [0, 384], sizes = [8, 128], strides = [1, 1]} : vector<8x512xf32> to vector<8x128xf32>
    %153 = arith.addf %151, %152 : vector<8x128xf32>
    %154 = vector.extract_strided_slice %131 {offsets = [0, 256], sizes = [8, 128], strides = [1, 1]} : vector<8x512xf32> to vector<8x128xf32>
    %cst_68 = arith.constant 0.000000e+00 : f32
    %155 = vector.broadcast %cst_68 : f32 to vector<8x128xf32>
    %156 = arith.maximumf %153, %155 : vector<8x128xf32>
    %cst_69 = arith.constant 0.000000e+00 : f32
    %157 = vector.broadcast %cst_69 : f32 to vector<8x128xf32>
    %158 = arith.maximumf %154, %157 : vector<8x128xf32>
    %cst_70 = arith.constant dense<0.000000e+00> : vector<8x128xf32>
    %159 = tpu.matmul %156, %23, %cst_70 {dimension_numbers = #tpu.dot_dimension_numbers<[1], [0], [0], [1], [0, 0, 1, 1], [], []>} : vector<8x128xf32>, vector<128x128xf32>, vector<8x128xf32> -> vector<8x128xf32>
    %cst_71 = arith.constant dense<0.000000e+00> : vector<8x128xf32>
    %160 = tpu.matmul %158, %24, %cst_71 {dimension_numbers = #tpu.dot_dimension_numbers<[1], [0], [0], [1], [0, 0, 1, 1], [], []>} : vector<8x128xf32>, vector<128x128xf32>, vector<8x128xf32> -> vector<8x128xf32>
    %161 = arith.addf %159, %160 : vector<8x128xf32>
    %162 = arith.negf %161 : vector<8x128xf32>
    %163 = math.exp %162 : vector<8x128xf32>
    %cst_72 = arith.constant 1.000000e+00 : f32
    %164 = vector.broadcast %cst_72 : f32 to vector<8x128xf32>
    %165 = arith.addf %164, %163 : vector<8x128xf32>
    %166 = arith.divf %164, %165 : vector<8x128xf32>
    %c0_73 = arith.constant 0 : index
    %c768 = arith.constant 768 : index
    %167 = vector.load %arg10[%c0_73, %c768] : memref<8x896xf32, #tpu.memory_space<vmem>>, vector<8x128xf32>
    tpu.vector_store %arg10[%c0_73, %c768], %166 {strides = array<i32>} : memref<8x896xf32, #tpu.memory_space<vmem>>, vector<8x128xf32>,
    return
  }
  func.func @transform_0(%arg0: i32) -> (i32, i32) {
    %c0_i32 = arith.constant 0 : i32
    %c0_i32_0 = arith.constant 0 : i32
    return %arg0, %c0_i32 : i32, i32
  }
  func.func @transform_1(%arg0: i32) -> (i32, i32) {
    %c0_i32 = arith.constant 0 : i32
    %c0_i32_0 = arith.constant 0 : i32
    %c0_i32_1 = arith.constant 0 : i32
    return %c0_i32, %c0_i32_0 : i32, i32
  }
  func.func @transform_2(%arg0: i32) -> (i32, i32) {
    %c0_i32 = arith.constant 0 : i32
    %c0_i32_0 = arith.constant 0 : i32
    %c0_i32_1 = arith.constant 0 : i32
    return %c0_i32, %c0_i32_0 : i32, i32
  }
  func.func @transform_3(%arg0: i32) -> (i32, i32) {
    %c0_i32 = arith.constant 0 : i32
    %c0_i32_0 = arith.constant 0 : i32
    %c0_i32_1 = arith.constant 0 : i32
    return %c0_i32, %c0_i32_0 : i32, i32
  }
  func.func @transform_4(%arg0: i32) -> (i32, i32) {
    %c0_i32 = arith.constant 0 : i32
    %c0_i32_0 = arith.constant 0 : i32
    %c0_i32_1 = arith.constant 0 : i32
    return %c0_i32, %c0_i32_0 : i32, i32
  }
  func.func @transform_5(%arg0: i32) -> (i32, i32) {
    %c0_i32 = arith.constant 0 : i32
    %c0_i32_0 = arith.constant 0 : i32
    %c0_i32_1 = arith.constant 0 : i32
    return %c0_i32, %c0_i32_0 : i32, i32
  }
  func.func @transform_6(%arg0: i32) -> (i32, i32) {
    %c0_i32 = arith.constant 0 : i32
    %c0_i32_0 = arith.constant 0 : i32
    %c0_i32_1 = arith.constant 0 : i32
    return %c0_i32, %c0_i32_0 : i32, i32
  }
  func.func @transform_7(%arg0: i32) -> (i32, i32) {
    %c0_i32 = arith.constant 0 : i32
    %c0_i32_0 = arith.constant 0 : i32
    %c0_i32_1 = arith.constant 0 : i32
    return %c0_i32, %c0_i32_0 : i32, i32
  }
  func.func @transform_8(%arg0: i32) -> (i32, i32) {
    %c0_i32 = arith.constant 0 : i32
    %c0_i32_0 = arith.constant 0 : i32
    %c0_i32_1 = arith.constant 0 : i32
    return %c0_i32, %c0_i32_0 : i32, i32
  }
  func.func @transform_9(%arg0: i32) -> (i32, i32) {
    %c0_i32 = arith.constant 0 : i32
    %c0_i32_0 = arith.constant 0 : i32
    return %arg0, %c0_i32 : i32, i32
  }
}

</mosaic_0001>

<bundles_post_ra>
// kernel: tpu_custom_call.1
= control target key start
LH: loop header
LB: loop body
LE: loop exit
PB: predicated region body
PF: predicated region fallthrough
CT: control target
= control target key end

     0   :  { %14 = vsyncpa [#allocation3], 0  ;;  %s5751_s0 = inlined_call_operand.hbm [shape: f32[8,32], index: 0, kind: input, shape index: {}]   ;;  %s5752_s1 = inlined_call_operand.hbm [shape: f32[32,64], index: 1, kind: input, shape index: {}]   ;;  %s5753_s2 = inlined_call_operand.vmem [shape: f32[1,64], index: 2, kind: input, shape index: {}]   ;;  %s5754_s3 = inlined_call_operand.hbm [shape: f32[64,128], index: 3, kind: input, shape index: {}]   ;;  %s5755_s4 = inlined_call_operand.vmem [shape: f32[1,128], index: 4, kind: input, shape index: {}]   ;;  %s5756_s5 = inlined_call_operand.hbm [shape: f32[128,896], index: 5, kind: input, shape index: {}]   ;;  %s5757_s6 = inlined_call_operand.vmem [shape: f32[1,896], index: 6, kind: input, shape index: {}]   ;;  %s5758_s7 = inlined_call_operand.hbm [shape: f32[128,512], index: 7, kind: input, shape index: {}]   ;;  %s5759_s8 = inlined_call_operand.hbm [shape: f32[256,128], index: 8, kind: input, shape index: {}]   ;;  %s5760_s9 = inlined_call_operand.hbm [shape: f32[8,896], index: 9, kind: output, shape index: {}]  }
   0x1   :  { %15 = vsyncpa [#allocation6], 0 }
   0x2   :  { %16 = vsyncpa [#allocation9], 0 }
   0x3   :  { %17 = vsyncpa [#allocation12], 0 }
   0x4   :  { %18 = vsyncpa [#allocation4], 0  ;;  %s4881_s30 = smov [#allocation5]   ;;  %s4717_s13 = scalar_lea.hbm %s5752_s1, 512 }
   0x5   :  { %s34_s10 = sshll.u32 %s4881_s30, 4  ;;  %p4718_p0 = scmp.ne.s32.totalorder %s5752_s1, %s4717_s13  ;;  %s35_s10 = int_to_ptr.vmem [resolvable:$true] %s34_s10 }
   0x6   :  { %p4721_p1 = scmp.lt.u32.totalorder %s4717_s13, %s5752_s1 }
   0x8   :  { %p4723_p2 = pnand %p4721_p1, %p4718_p0 }
   0xa   :  { %4726 = shalt.err (!%p4723_p2)
}
   0xb   :  { %s4727_s18 = scalar_lea.vmem %s35_s10, 512  ;;  %p4732_p4 = scmp.lt.s32.totalorder %s35_s10, %s35_s10 }
   0xc   :  { %p4728_p3 = scmp.ne.s32.totalorder %s35_s10, %s4727_s18  ;;  %p4733_p5 = scmp.lt.s32.totalorder %s4727_s18, %s4727_s18 }
   0xe   :  { %p4734_p6 = por %p4733_p5, %p4732_p4 }
  0x10   :  { %p4735_p7 = pnand %p4734_p6, %p4728_p3 }
  0x12   :  { %4738 = shalt.err (!%p4735_p7)
}
  0x13   :  { %s4882_s19 = smov 128   ;;  %s4883_s20 = smov 8  }
  0x14   :  { %40 = dma.hbm_to_vmem [thread:$0]  %s5752_s1, 512, %s35_s10, [#allocation6], %s4882_s19, %s4882_s19, %s4883_s20  }
  0x15   :  { %s4884_s23 = smov [#allocation8]   ;;  %s4739_s27 = scalar_lea.hbm %s5756_s5, 14336 }
  0x16   :  { %s62_s24 = sshll.u32 %s4884_s23, 4  ;;  %p4740_p8 = scmp.ne.s32.totalorder %s5756_s5, %s4739_s27  ;;  %s63_s24 = int_to_ptr.vmem [resolvable:$true] %s62_s24 }
  0x17   :  { %p4743_p9 = scmp.lt.u32.totalorder %s4739_s27, %s5756_s5 }
  0x19   :  { %p4745_p10 = pnand %p4743_p9, %p4740_p8 }
  0x1b   :  { %4748 = shalt.err (!%p4745_p10)
}
  0x1c   :  { %s4749_s12 = scalar_lea.vmem %s63_s24, 14336  ;;  %p4754_p12 = scmp.lt.s32.totalorder %s63_s24, %s63_s24 }
  0x1d   :  { %p4750_p11 = scmp.ne.s32.totalorder %s63_s24, %s4749_s12  ;;  %p4755_p13 = scmp.lt.s32.totalorder %s4749_s12, %s4749_s12 }
  0x1f   :  { %p4756_p0 = por %p4755_p13, %p4754_p12 }
  0x21   :  { %p4757_p1 = pnand %p4756_p0, %p4750_p11 }
  0x23   :  { %4760 = shalt.err (!%p4757_p1)
}
  0x24   :  { %s4885_s1 = smov 896   ;;  %s4886_s10 = smov 56  }
  0x25   :  { %68 = dma.hbm_to_vmem [thread:$0]  %s5756_s5, 14336, %s63_s24, [#allocation9], %s4885_s1, %s4885_s1, %s4886_s10  }
  0x26   :  { %s4887_s15 = smov [#allocation2]   ;;  %s4888_s17 = smov [#allocation7]  }
  0x27   :  { %s25_s16 = sshll.u32 %s4887_s15, 4  ;;  %s48_s18 = sshll.u32 %s4888_s17, 4  ;;  %s26_s16 = int_to_ptr.vmem [resolvable:$true] %s25_s16  ;;  %s4974_s18 = int_to_ptr.vmem [resolvable:$true] %s48_s18 }
  0x28   :  { %s4761_s23 = scalar_lea.hbm %s5751_s0, 128 }
  0x29   :  { %p4762_p2 = scmp.ne.s32.totalorder %s5751_s0, %s4761_s23  ;;  %p4765_p3 = scmp.lt.u32.totalorder %s4761_s23, %s5751_s0 }
  0x2b   :  { %p4767_p4 = pnand %p4765_p3, %p4762_p2 }
  0x2d   :  { %4770 = shalt.err (!%p4767_p4)
}
  0x2e   :  { %s4771_s5 = scalar_lea.vmem %s26_s16, 128  ;;  %p4776_p6 = scmp.lt.s32.totalorder %s26_s16, %s26_s16 }
  0x2f   :  { %p4772_p5 = scmp.ne.s32.totalorder %s26_s16, %s4771_s5  ;;  %p4777_p7 = scmp.lt.s32.totalorder %s4771_s5, %s4771_s5 }
  0x31   :  { %p4778_p8 = por %p4777_p7, %p4776_p6 }
  0x33   :  { %p4779_p9 = pnand %p4778_p8, %p4772_p5 }
  0x35   :  { %4782 = shalt.err (!%p4779_p9)
}
  0x36   :  { %28 = dma.hbm_to_vmem [thread:$0]  %s5751_s0, 128, %s26_s16, [#allocation3]  }
  0x37   :  { %s4783_s12 = scalar_lea.hbm %s5754_s3, 1024 }
  0x38   :  { %p4784_p10 = scmp.ne.s32.totalorder %s5754_s3, %s4783_s12  ;;  %p4787_p11 = scmp.lt.u32.totalorder %s4783_s12, %s5754_s3 }
  0x3a   :  { %p4789_p12 = pnand %p4787_p11, %p4784_p10 }
  0x3c   :  { %4792 = shalt.err (!%p4789_p12)
}
  0x3d   :  { %s4793_s15 = scalar_lea.vmem %s4974_s18, 1024  ;;  %p4798_p0 = scmp.lt.s32.totalorder %s4974_s18, %s4974_s18 }
  0x3e   :  { %p4794_p13 = scmp.ne.s32.totalorder %s4974_s18, %s4793_s15  ;;  %p4799_p1 = scmp.lt.s32.totalorder %s4793_s15, %s4793_s15 }
  0x40   :  { %p4800_p2 = por %p4799_p1, %p4798_p0 }
  0x42   :  { %p4801_p3 = pnand %p4800_p2, %p4794_p13 }
  0x44   :  { %4804 = shalt.err (!%p4801_p3)
}
  0x45   :  { %54 = dma.hbm_to_vmem [thread:$0]  %s5754_s3, 1024, %s4974_s18, [#allocation6], %s4882_s19, %s4882_s19, %s4883_s20  }
  0x46   :  { %s4889_s17 = smov [#allocation10]   ;;  %s4805_s25 = scalar_lea.hbm %s5758_s7, 8192 }
  0x47   :  { %s76_s21 = sshll.u32 %s4889_s17, 4  ;;  %p4806_p4 = scmp.ne.s32.totalorder %s5758_s7, %s4805_s25  ;;  %s77_s21 = int_to_ptr.vmem [resolvable:$true] %s76_s21 }
  0x48   :  { %p4809_p5 = scmp.lt.u32.totalorder %s4805_s25, %s5758_s7 }
  0x4a   :  { %p4811_p6 = pnand %p4809_p5, %p4806_p4 }
  0x4c   :  { %4814 = shalt.err (!%p4811_p6)
}
  0x4d   :  { %s4815_s24 = scalar_lea.vmem %s77_s21, 8192  ;;  %p4820_p8 = scmp.lt.s32.totalorder %s77_s21, %s77_s21 }
  0x4e   :  { %p4816_p7 = scmp.ne.s32.totalorder %s77_s21, %s4815_s24  ;;  %p4821_p9 = scmp.lt.s32.totalorder %s4815_s24, %s4815_s24 }
  0x50   :  { %p4822_p10 = por %p4821_p9, %p4820_p8 }
  0x52   :  { %p4823_p11 = pnand %p4822_p10, %p4816_p7 }
  0x54   :  { %4826 = shalt.err (!%p4823_p11)
}
  0x55   :  { %s4890_s3 = smov 512   ;;  %s4891_s18 = smov 32  }
  0x56   :  { %82 = dma.hbm_to_vmem [thread:$0]  %s5758_s7, 8192, %s77_s21, [#allocation9], %s4890_s3, %s4890_s3, %s4891_s18  }
  0x57   :  { %s4892_s11 = smov [#allocation11]   ;;  %s4827_s13 = scalar_lea.hbm %s5759_s8, 4096 }
  0x58   :  { %s88_s12 = sshll.u32 %s4892_s11, 4  ;;  %p4828_p12 = scmp.ne.s32.totalorder %s5759_s8, %s4827_s13  ;;  %s89_s12 = int_to_ptr.vmem [resolvable:$true] %s88_s12 }
  0x59   :  { %p4831_p13 = scmp.lt.u32.totalorder %s4827_s13, %s5759_s8 }
  0x5b   :  { %p4833_p0 = pnand %p4831_p13, %p4828_p12 }
  0x5d   :  { %4836 = shalt.err (!%p4833_p0)
}
  0x5e   :  { %s4837_s17 = scalar_lea.vmem %s89_s12, 4096  ;;  %p4842_p2 = scmp.lt.s32.totalorder %s89_s12, %s89_s12 }
  0x5f   :  { %p4838_p1 = scmp.ne.s32.totalorder %s89_s12, %s4837_s17  ;;  %p4843_p3 = scmp.lt.s32.totalorder %s4837_s17, %s4837_s17 }
  0x61   :  { %p4844_p4 = por %p4843_p3, %p4842_p2 }
  0x63   :  { %p4845_p5 = pnand %p4844_p4, %p4838_p1 }
  0x65   :  { %4848 = shalt.err (!%p4845_p5)
}
  0x66   :  { %94 = dma.hbm_to_vmem [thread:$0]  %s5759_s8, 4096, %s89_s12, [#allocation12], %s4882_s19, %s4882_s19, %s4883_s20  }
  0x67   :  { %4871 = dma.done.wait [#allocation3], 128  }
  0x68   :  { %4872 = vsyncadd [#allocation3], 4294967168 }
  0x69   :  { %4873 = dma.done.wait [#allocation6], 1536  }
  0x6a   :  { %4874 = vsyncadd [#allocation6], 4294965760 }
  0x6b   :  { %4875 = dma.done.wait [#allocation9], 22528  }
  0x6c   :  { %4876 = vsyncadd [#allocation9], 4294944768 }
  0x6d   :  { %4877 = dma.done.wait [#allocation12], 4096  }
  0x6e   :  { %4878 = vsyncadd [#allocation12], 4294963200  ;;  %v4893_v0 = vmov 0.0|0.0   ;;  %vm4894_vm0 = vmmov 0   ;;  %v5762_v1 = vmov 0.0   ;;  %v114_v2 = vld [vmem:[#allocation5] sm:$0xff] }
  0x6f   :  { %3725 = vmatprep.subr.bf16.mxu0 %v4893_v0  ;;  %3178 = vmatprep.mubr.msk.f32.mxu0 %vm4894_vm0, %v5762_v1  ;;  %v115_v3 = vld [vmem:[#allocation5 + $0x8] sm:$0xff]  ;;  %v116_v4 = vld [vmem:[#allocation5 + $0x10] sm:$0xff]  ;;  %v117_v6 = vld [vmem:[#allocation5 + $0x18] sm:$0xff]  ;;  %vm125_vm1 = vcmask 261120   ;;  %vm215_vm2 = vcmask 523264  }
  0x70   :  { %3731 = vmatprep.subr.bf16.mxu1 %v4893_v0  ;;  %3197 = vmatprep.mubr.msk.f32.mxu1 %vm4894_vm0, %v5762_v1  ;;  %v3726_v5 = vpack.c.bf16 %v115_v3, %v114_v2  ;;  %v200_v7 = vld [vmem:[#allocation7] sm:$0xff]  ;;  %v201_v8 = vld [vmem:[#allocation7 + $0x8] sm:$0xff]  ;;  %v202_v9 = vld [vmem:[#allocation7 + $0x10] sm:$0xff]  ;;  %v3729_v11 = vpack.c.bf16 %v117_v6, %v116_v4 }
  0x71   :  { %v203_v10 = vld [vmem:[#allocation7 + $0x18] sm:$0xff]  ;;  %v3732_v12 = vpack.c.bf16 %v201_v8, %v200_v7  ;;  %v204_v14 = vld [vmem:[#allocation7 + $0x20] sm:$0xff]  ;;  %v205_v15 = vld [vmem:[#allocation7 + $0x28] sm:$0xff] }
  0x72   :  { %3727 = vmatpush3.bf16.msra.mxu0 %v3726_v5  ;;  %v3735_v13 = vpack.c.bf16 %v203_v10, %v202_v9  ;;  %v113_v16 = vld [vmem:[#allocation2] sm:$0xff]  ;;  %v3738_v17 = vpack.c.bf16 %v205_v15, %v204_v14  ;;  %v206_v18 = vld [vmem:[#allocation7 + $0x30] sm:$0xff]  ;;  %v291_v21 = vld [vmem:[#allocation8 + $0x8] sm:$0xff] }
  0x73   :  { %3728 = vmatprep.subr.bf16.mxu0 %v4893_v0  ;;  %3733 = vmatpush3.bf16.msra.mxu1 %v3732_v12  ;;  %v207_v19 = vld [vmem:[#allocation7 + $0x38] sm:$0xff]  ;;  %v298_v22 = vld [vmem:[#allocation8 + $0x40] sm:$0xff]  ;;  %v295_v24 = vld [vmem:[#allocation8 + $0x28] sm:$0xff] }
  0x74   :  { %3734 = vmatprep.subr.bf16.mxu1 %v4893_v0  ;;  %v3741_v20 = vpack.c.bf16 %v207_v19, %v206_v18  ;;  %v3743_v23 = vpack.c.bf16 %v298_v22, %v291_v21  ;;  %v302_v25 = vld [vmem:[#allocation8 + $0x60] sm:$0xff]  ;;  %v301_v28 = vld [vmem:[#allocation8 + $0x58] sm:$0xff]  ;;  %v316_v31 = vld [vmem:[#allocation8 + $0xd0] sm:$0xff] }
  0x75   :  { %v3807_v26 = vpack.c.bf16 %v302_v25, %v295_v24  ;;  %v294_v27 = vld [vmem:[#allocation8 + $0x20] sm:$0xff]  ;;  %v309_v30 = vld [vmem:[#allocation8 + $0x98] sm:$0xff]  ;;  %v308_v32 = vld [vmem:[#allocation8 + $0x90] sm:$0xff] }
  0x76   :  { %3730 = vmatpush3.bf16.msra.mxu0 %v3729_v11  ;;  %v3809_v29 = vpack.c.bf16 %v301_v28, %v294_v27  ;;  %v3811_v33 = vpack.c.bf16 %v316_v31, %v309_v30  ;;  %v315_v34 = vld [vmem:[#allocation8 + $0xc8] sm:$0xff]  ;;  %v330_v37 = vld [vmem:[#allocation8 + $0x140] sm:$0xff]  ;;  %v329_v40 = vld [vmem:[#allocation8 + $0x138] sm:$0xff] }
  0x77   :  { %3736 = vmatpush3.bf16.msra.mxu1 %v3735_v13  ;;  %3808 = vmatprep.subr.bf16.mxu0 %v3807_v26  ;;  %v3813_v35 = vpack.c.bf16 %v315_v34, %v308_v32  ;;  %v323_v36 = vld [vmem:[#allocation8 + $0x108] sm:$0xff]  ;;  %v322_v38 = vld [vmem:[#allocation8 + $0x100] sm:$0xff]  ;;  %v337_v42 = vld [vmem:[#allocation8 + $0x178] sm:$0xff] }
  0x78   :  { %3737 = vmatprep.subr.bf16.mxu1 %v4893_v0  ;;  %v3815_v39 = vpack.c.bf16 %v330_v37, %v323_v36  ;;  %v3817_v41 = vpack.c.bf16 %v329_v40, %v322_v38  ;;  %v344_v43 = vld [vmem:[#allocation8 + $0x1b0] sm:$0xff]  ;;  %v343_v46 = vld [vmem:[#allocation8 + $0x1a8] sm:$0xff]  ;;  %v358_v49 = vld [vmem:[#allocation8 + $0x220] sm:$0xff] }
  0x79   :  { %3179 = vmatmul.mubr.msk.f32.vlgmr.msra.gmra.mrb[0].mxu0 %vm125_vm1, %v113_v16  ;;  %v336_v44 = vld [vmem:[#allocation8 + $0x170] sm:$0xff]  ;;  %v3819_v45 = vpack.c.bf16 %v344_v43, %v337_v42  ;;  %v351_v48 = vld [vmem:[#allocation8 + $0x1e8] sm:$0xff]  ;;  %v350_v50 = vld [vmem:[#allocation8 + $0x1e0] sm:$0xff] }
  0x7a   :  { %645 = vmatprep.mubr.f32.mxu0 %v5762_v1  ;;  %3810 = vmatpush1.bf16.msra.mxu0 %v3809_v29  ;;  %v3821_v47 = vpack.c.bf16 %v343_v46, %v336_v44  ;;  %v3823_v51 = vpack.c.bf16 %v358_v49, %v351_v48  ;;  %v357_v52 = vld [vmem:[#allocation8 + $0x218] sm:$0xff]  ;;  %v372_v55 = vld [vmem:[#allocation8 + $0x290] sm:$0xff]  ;;  %v371_v58 = vld [vmem:[#allocation8 + $0x288] sm:$0xff] }
  0x7b   :  { %3739 = vmatpush3.bf16.msra.mxu1 %v3738_v17  ;;  %3812 = vmatprep.subr.bf16.mxu0 %v3811_v33  ;;  %v3825_v53 = vpack.c.bf16 %v357_v52, %v350_v50  ;;  %v365_v54 = vld [vmem:[#allocation8 + $0x258] sm:$0xff]  ;;  %v364_v56 = vld [vmem:[#allocation8 + $0x250] sm:$0xff]  ;;  %v379_v60 = vld [vmem:[#allocation8 + $0x2c8] sm:$0xff] }
  0x7c   :  { %3740 = vmatprep.subr.bf16.mxu1 %v4893_v0  ;;  %v3827_v57 = vpack.c.bf16 %v372_v55, %v365_v54  ;;  %v3829_v59 = vpack.c.bf16 %v371_v58, %v364_v56  ;;  %v386_v61 = vld [vmem:[#allocation8 + $0x300] sm:$0xff]  ;;  %v385_v2 = vld [vmem:[#allocation8 + $0x2f8] sm:$0xff]  ;;  %v312_v9 = vld [vmem:[#allocation8 + $0xb0] sm:$0xff] }
  0x7d   :  { %v378_v62 = vld [vmem:[#allocation8 + $0x2c0] sm:$0xff]  ;;  %v3831_v63 = vpack.c.bf16 %v386_v61, %v379_v60  ;;  %v2890_v4 = vld [vmem:[%s5753_s2] ss:$0 sm:$0xff]  ;;  %v304_v15 = vld [vmem:[#allocation8 + $0x70] sm:$0xff] }
  0x7e   :  { %3814 = vmatpush1.bf16.msra.mxu0 %v3813_v35  ;;  %v3833_v3 = vpack.c.bf16 %v385_v2, %v378_v62  ;;  %v290_v5 = vld [vmem:[#allocation8] sm:$0xff]  ;;  %v297_v6 = vld [vmem:[#allocation8 + $0x38] sm:$0xff]  ;;  %v311_v16 = vld [vmem:[#allocation8 + $0xa8] sm:$0xff] }
  0x7f   :  { %3742 = vmatpush3.bf16.msra.mxu1 %v3741_v20  ;;  %3816 = vmatprep.subr.bf16.mxu0 %v3815_v39  ;;  %v305_v8 = vld [vmem:[#allocation8 + $0x78] sm:$0xff]  ;;  %v3745_v12 = vpack.c.bf16 %v297_v6, %v290_v5  ;;  %v319_v17 = vld [vmem:[#allocation8 + $0xe8] sm:$0xff]  ;;  %v326_v18 = vld [vmem:[#allocation8 + $0x120] sm:$0xff]  ;;  %v3749_v19 = vpack.c.bf16 %v311_v16, %v304_v15 }
  0x80   :  { %3744 = vmatprep.subr.bf16.mxu1 %v3743_v23  ;;  %v3747_v14 = vpack.c.bf16 %v312_v9, %v305_v8  ;;  %v3751_v20 = vpack.c.bf16 %v326_v18, %v319_v17  ;;  %v318_v21 = vld [vmem:[#allocation8 + $0xe0] sm:$0xff]  ;;  %v325_v22 = vld [vmem:[#allocation8 + $0x118] sm:$0xff]  ;;  %v340_v24 = vld [vmem:[#allocation8 + $0x190] sm:$0xff] }
  0x81   :  { %v333_v23 = vld [vmem:[#allocation8 + $0x158] sm:$0xff]  ;;  %v3753_v25 = vpack.c.bf16 %v325_v22, %v318_v21  ;;  %v332_v27 = vld [vmem:[#allocation8 + $0x150] sm:$0xff]  ;;  %v339_v28 = vld [vmem:[#allocation8 + $0x188] sm:$0xff] }
  0x82   :  { %3818 = vmatpush1.bf16.msra.mxu0 %v3817_v41  ;;  %v3755_v26 = vpack.c.bf16 %v340_v24, %v333_v23  ;;  %v347_v29 = vld [vmem:[#allocation8 + $0x1c8] sm:$0xff]  ;;  %v354_v30 = vld [vmem:[#allocation8 + $0x200] sm:$0xff]  ;;  %v3757_v31 = vpack.c.bf16 %v339_v28, %v332_v27  ;;  %v353_v34 = vld [vmem:[#allocation8 + $0x1f8] sm:$0xff] }
  0x83   :  { %3820 = vmatprep.subr.bf16.mxu0 %v3819_v45  ;;  %v3759_v32 = vpack.c.bf16 %v354_v30, %v347_v29  ;;  %v346_v33 = vld [vmem:[#allocation8 + $0x1c0] sm:$0xff]  ;;  %v361_v35 = vld [vmem:[#allocation8 + $0x238] sm:$0xff]  ;;  %v368_v36 = vld [vmem:[#allocation8 + $0x270] sm:$0xff] }
  0x84   :  { %v3761_v37 = vpack.c.bf16 %v353_v34, %v346_v33  ;;  %v3763_v38 = vpack.c.bf16 %v368_v36, %v361_v35  ;;  %v360_v39 = vld [vmem:[#allocation8 + $0x230] sm:$0xff]  ;;  %v367_v40 = vld [vmem:[#allocation8 + $0x268] sm:$0xff]  ;;  %v382_v42 = vld [vmem:[#allocation8 + $0x2e0] sm:$0xff] }
  0x85   :  { %v375_v41 = vld [vmem:[#allocation8 + $0x2a8] sm:$0xff]  ;;  %v3765_v43 = vpack.c.bf16 %v367_v40, %v360_v39  ;;  %v374_v45 = vld [vmem:[#allocation8 + $0x2a0] sm:$0xff]  ;;  %v381_v46 = vld [vmem:[#allocation8 + $0x2d8] sm:$0xff] }
  0x86   :  { %3822 = vmatpush1.bf16.msra.mxu0 %v3821_v47  ;;  %v3767_v44 = vpack.c.bf16 %v382_v42, %v375_v41  ;;  %v3769_v47 = vpack.c.bf16 %v381_v46, %v374_v45  ;;  %v389_v48 = vld [vmem:[#allocation8 + $0x318] sm:$0xff]  ;;  %v396_v49 = vld [vmem:[#allocation8 + $0x350] sm:$0xff]  ;;  %v395_v52 = vld [vmem:[#allocation8 + $0x348] sm:$0xff] }
  0x87   :  { %3824 = vmatprep.subr.bf16.mxu0 %v3823_v51  ;;  %v3771_v50 = vpack.c.bf16 %v396_v49, %v389_v48  ;;  %v388_v51 = vld [vmem:[#allocation8 + $0x310] sm:$0xff]  ;;  %v293_v60 = vld [vmem:[#allocation8 + $0x18] sm:$0xff]  ;;  %v734_v2 = vld [vmem:[#allocation10 + $0x28] sm:$0xff] }
  0x88   :  { %v3773_v54 = vpack.c.bf16 %v395_v52, %v388_v51  ;;  %v400_v55 = vld [vmem:[#allocation8 + $0x370] sm:$0xff]  ;;  %v299_v6 = vld [vmem:[#allocation8 + $0x48] sm:$0xff]  ;;  %v314_v9 = vld [vmem:[#allocation8 + $0xc0] sm:$0xff] }
  0x89   :  { %v392_v56 = vld [vmem:[#allocation8 + $0x330] sm:$0xff]  ;;  %v742_v15 = vld [vmem:[#allocation10 + $0x68] sm:$0xff]  ;;  %v321_v21 = vld [vmem:[#allocation8 + $0xf8] sm:$0xff] }
  0x8a   :  { %3826 = vmatpush1.bf16.msra.mxu0 %v3825_v53  ;;  %v393_v53 = vld [vmem:[#allocation8 + $0x338] sm:$0xff]  ;;  %v300_v61 = vld [vmem:[#allocation8 + $0x50] sm:$0xff]  ;;  %v746_v27 = vld [vmem:[#allocation10 + $0x88] sm:$0xff] }
  0x8b   :  { %3828 = vmatprep.subr.bf16.mxu0 %v3827_v57  ;;  %v399_v57 = vld [vmem:[#allocation8 + $0x368] sm:$0xff]  ;;  %v3835_v58 = vpack.c.bf16 %v400_v55, %v393_v53  ;;  %v3775_v62 = vpack.c.bf16 %v300_v61, %v293_v60  ;;  %v292_v5 = vld [vmem:[#allocation8 + $0x10] sm:$0xff]  ;;  %v342_v35 = vld [vmem:[#allocation8 + $0x1a0] sm:$0xff] }
  0x8c   :  { %v3777_v16 = vpack.c.bf16 %v299_v6, %v292_v5  ;;  %v328_v23 = vld [vmem:[#allocation8 + $0x130] sm:$0xff]  ;;  %v750_v28 = vld [vmem:[#allocation10 + $0xa8] sm:$0xff]  ;;  %v349_v45 = vld [vmem:[#allocation8 + $0x1d8] sm:$0xff] }
  0x8d   :  { %v3783_v30 = vpack.c.bf16 %v328_v23, %v321_v21  ;;  %v335_v33 = vld [vmem:[#allocation8 + $0x168] sm:$0xff]  ;;  %v5069_v36 = vpack.c.bf16 %v750_v28, %v746_v27  ;;  %v753_v49 = vld [vmem:[#allocation10 + $0xc0] sm:$0xff]  ;;  %v348_v55 = vld [vmem:[#allocation8 + $0x1d0] sm:$0xff] }
  0x8e   :  { %3830 = vmatpush1.bf16.msra.mxu0 %v3829_v59  ;;  %v3837_v59 = vpack.c.bf16 %v399_v57, %v392_v56  ;;  %v754_v39 = vld [vmem:[#allocation10 + $0xc8] sm:$0xff]  ;;  %v3787_v42 = vpack.c.bf16 %v342_v35, %v335_v33  ;;  %v761_v61 = vld [vmem:[#allocation10 + $0x100] sm:$0xff] }
  0x8f   :  { %3832 = vmatprep.subr.bf16.mxu0 %v3831_v63  ;;  %v730_v63 = vld [vmem:[#allocation10 + $0x8] sm:$0xff]  ;;  %v362_v6 = vld [vmem:[#allocation8 + $0x240] sm:$0xff] }
  0x90   :  { %v758_v40 = vld [vmem:[#allocation10 + $0xe8] sm:$0xff]  ;;  %v777_v27 = vld [vmem:[#allocation10 + $0x180] sm:$0xff] }
  0x91   :  { %v5076_v48 = vpack.c.bf16 %v758_v40, %v754_v39  ;;  %v762_v51 = vld [vmem:[#allocation10 + $0x108] sm:$0xff]  ;;  %v781_v28 = vld [vmem:[#allocation10 + $0x1a0] sm:$0xff] }
  0x92   :  { %3834 = vmatpush1.bf16.msra.mxu0 %v3833_v3  ;;  %v5050_v3 = vpack.c.bf16 %v734_v2, %v730_v63  ;;  %v766_v52 = vld [vmem:[#allocation10 + $0x128] sm:$0xff]  ;;  %v5097_v33 = vpack.c.bf16 %v781_v28, %v777_v27  ;;  %v310_v40 = vld [vmem:[#allocation8 + $0xa0] sm:$0xff]  ;;  %v751_v27 = vld [vmem:[#allocation10 + $0xb0] sm:$0xff] }
  0x93   :  { %3836 = vmatprep.subr.bf16.mxu0 %v3835_v58  ;;  %v355_v56 = vld [vmem:[#allocation8 + $0x208] sm:$0xff]  ;;  %v5082_v60 = vpack.c.bf16 %v766_v52, %v762_v51  ;;  %v352_v51 = vld [vmem:[#allocation8 + $0x1f0] sm:$0xff]  ;;  %v756_v28 = vld [vmem:[#allocation10 + $0xd8] sm:$0xff] }
  0x94   :  { %v363_v57 = vld [vmem:[#allocation8 + $0x248] sm:$0xff] }
  0x95   :  { %v770_v63 = vld [vmem:[#allocation10 + $0x148] sm:$0xff] }
  0x96   :  { %3838 = vmatpush1.bf16.msra.mxu0 %v3837_v59  ;;  %v370_v59 = vld [vmem:[#allocation8 + $0x280] sm:$0xff]  ;;  %v774_v2 = vld [vmem:[#allocation10 + $0x168] sm:$0xff] }
  0x97   :  { %3864 = vmatprep.subr.bf16.mxu0 %v5050_v3  ;;  %v3795_v5 = vpack.c.bf16 %v370_v59, %v363_v57  ;;  %v391_v21 = vld [vmem:[#allocation8 + $0x328] sm:$0xff]  ;;  %v380_v57 = vld [vmem:[#allocation8 + $0x2d0] sm:$0xff] }
  0x98   :  { %v359_v52 = vld [vmem:[#allocation8 + $0x228] sm:$0xff] }
  0x99   :  { %v387_v59 = vld [vmem:[#allocation8 + $0x308] sm:$0xff] }
 0x14c   :  { %v195_v7 = vpop.f32.mrb[0].mxu0 }
 0x14d   :  { %v196_v10 = vadd.f32 %v2890_v4, %v195_v7  ;;  %v3180_v11 = vpop.f32.mrb[1].mxu0  ;;  %v2892_v4 = vld [vmem:[%s5755_s4] ss:$0 sm:$0xff]  ;;  %v307_v7 = vld [vmem:[#allocation8 + $0x88] sm:$0xff] }
 0x14e   :  { %v733_v11 = vld [vmem:[#allocation10 + $0x20] sm:$0xff]  ;;  %v3779_v18 = vpack.c.bf16 %v314_v9, %v307_v7  ;;  %v369_v7 = vld [vmem:[#allocation8 + $0x278] sm:$0xff] }
 0x14f   :  { %v199_v13 = vmax.f32 %v196_v10, 0.0  ;;  %v729_v10 = vld [vmem:[#allocation10] sm:$0xff] }
 0x150   :  { %v5058_v22 = vpack.c.bf16 %v733_v11, %v729_v10  ;;  %v384_v10 = vld [vmem:[#allocation8 + $0x2f0] sm:$0xff]  ;;  %v5088_v11 = vpack.c.bf16 %v774_v2, %v770_v63  ;;  %v401_v63 = vld [vmem:[#allocation8 + $0x378] sm:$0xff] }
 0x151   :  { %3198 = vmatmul.mubr.msk.f32.vlgmr.msra.gmra.mrb[0].mxu1 %vm215_vm2, %v199_v13  ;;  %v732_v2 = vld [vmem:[#allocation10 + $0x18] sm:$0xff] }
 0x152   :  { %3746 = vmatpush1.bf16.msra.mxu1 %v3745_v12  ;;  %503 = vmatprep.mubr.f32.mxu1 %v5762_v1 }
 0x153   :  { %3748 = vmatprep.subr.bf16.mxu1 %v3747_v14  ;;  %v738_v14 = vld [vmem:[#allocation10 + $0x48] sm:$0xff] }
 0x154   :  { %v5060_v24 = vpack.c.bf16 %v742_v15, %v738_v14  ;;  %v778_v14 = vld [vmem:[#allocation10 + $0x188] sm:$0xff] }
 0x155   :  { %v782_v15 = vld [vmem:[#allocation10 + $0x1a8] sm:$0xff] }
 0x156   :  { %3750 = vmatpush1.bf16.msra.mxu1 %v3749_v19  ;;  %v306_v19 = vld [vmem:[#allocation8 + $0x80] sm:$0xff] }
 0x157   :  { %3752 = vmatprep.subr.bf16.mxu1 %v3751_v20  ;;  %v313_v20 = vld [vmem:[#allocation8 + $0xb8] sm:$0xff] }
 0x158   :  { %v3781_v29 = vpack.c.bf16 %v313_v20, %v306_v19  ;;  %v376_v19 = vld [vmem:[#allocation8 + $0x2b0] sm:$0xff]  ;;  %v383_v20 = vld [vmem:[#allocation8 + $0x2e8] sm:$0xff] }
 0x15a   :  { %3754 = vmatpush1.bf16.msra.mxu1 %v3753_v25  ;;  %v737_v25 = vld [vmem:[#allocation10 + $0x40] sm:$0xff] }
 0x15b   :  { %3756 = vmatprep.subr.bf16.mxu1 %v3755_v26  ;;  %v741_v26 = vld [vmem:[#allocation10 + $0x60] sm:$0xff] }
 0x15c   :  { %v5066_v34 = vpack.c.bf16 %v741_v26, %v737_v25  ;;  %v398_v25 = vld [vmem:[#allocation8 + $0x360] sm:$0xff]  ;;  %v5094_v26 = vpack.c.bf16 %v782_v15, %v778_v14  ;;  %v739_v15 = vld [vmem:[#allocation10 + $0x50] sm:$0xff] }
 0x15e   :  { %3758 = vmatpush1.bf16.msra.mxu1 %v3757_v31  ;;  %v320_v31 = vld [vmem:[#allocation8 + $0xf0] sm:$0xff] }
 0x15f   :  { %3760 = vmatprep.subr.bf16.mxu1 %v3759_v32  ;;  %v327_v32 = vld [vmem:[#allocation8 + $0x128] sm:$0xff] }
 0x160   :  { %v3785_v41 = vpack.c.bf16 %v327_v32, %v320_v31  ;;  %v390_v31 = vld [vmem:[#allocation8 + $0x320] sm:$0xff]  ;;  %v397_v32 = vld [vmem:[#allocation8 + $0x358] sm:$0xff] }
 0x161   :  { %v3805_v35 = vpack.c.bf16 %v397_v32, %v390_v31  ;;  %v755_v31 = vld [vmem:[#allocation10 + $0xd0] sm:$0xff] }
 0x162   :  { %3762 = vmatpush1.bf16.msra.mxu1 %v3761_v37  ;;  %v745_v37 = vld [vmem:[#allocation10 + $0x80] sm:$0xff]  ;;  %v759_v32 = vld [vmem:[#allocation10 + $0xf0] sm:$0xff] }
 0x163   :  { %3764 = vmatprep.subr.bf16.mxu1 %v3763_v38  ;;  %v749_v38 = vld [vmem:[#allocation10 + $0xa0] sm:$0xff] }
 0x164   :  { %v5073_v46 = vpack.c.bf16 %v749_v38, %v745_v37  ;;  %v296_v37 = vld [vmem:[#allocation8 + $0x30] sm:$0xff]  ;;  %v303_v38 = vld [vmem:[#allocation8 + $0x68] sm:$0xff] }
 0x165   :  { %v3840_v39 = vpack.c.bf16 %v303_v38, %v296_v37  ;;  %v768_v37 = vld [vmem:[#allocation10 + $0x138] sm:$0xff]  ;;  %v5134_v38 = vpack.c.bf16 %v759_v32, %v755_v31 }
 0x166   :  { %3766 = vmatpush1.bf16.msra.mxu1 %v3765_v43  ;;  %v334_v43 = vld [vmem:[#allocation8 + $0x160] sm:$0xff] }
 0x167   :  { %3768 = vmatprep.subr.bf16.mxu1 %v3767_v44  ;;  %v341_v44 = vld [vmem:[#allocation8 + $0x198] sm:$0xff] }
 0x168   :  { %v3789_v53 = vpack.c.bf16 %v341_v44, %v334_v43  ;;  %v324_v43 = vld [vmem:[#allocation8 + $0x110] sm:$0xff]  ;;  %v331_v44 = vld [vmem:[#allocation8 + $0x148] sm:$0xff] }
 0x16a   :  { %3770 = vmatpush1.bf16.msra.mxu1 %v3769_v47  ;;  %v356_v47 = vld [vmem:[#allocation8 + $0x210] sm:$0xff] }
 0x16b   :  { %3772 = vmatprep.subr.bf16.mxu1 %v3771_v50  ;;  %v757_v50 = vld [vmem:[#allocation10 + $0xe0] sm:$0xff] }
 0x16c   :  { %v5079_v58 = vpack.c.bf16 %v757_v50, %v753_v49  ;;  %v345_v49 = vld [vmem:[#allocation8 + $0x1b8] sm:$0xff] }
 0x16e   :  { %3774 = vmatpush1.bf16.msra.mxu1 %v3773_v54  ;;  %v3791_v54 = vpack.c.bf16 %v356_v47, %v349_v45  ;;  %v3846_v45 = vpack.c.bf16 %v331_v44, %v324_v43  ;;  %v338_v47 = vld [vmem:[#allocation8 + $0x180] sm:$0xff]  ;;  %v776_v43 = vld [vmem:[#allocation10 + $0x178] sm:$0xff] }
 0x16f   :  { %3776 = vmatprep.subr.bf16.mxu1 %v3775_v62  ;;  %v765_v62 = vld [vmem:[#allocation10 + $0x120] sm:$0xff]  ;;  %v3849_v50 = vpack.c.bf16 %v345_v49, %v338_v47  ;;  %v771_v47 = vld [vmem:[#allocation10 + $0x150] sm:$0xff] }
 0x170   :  { %v5085_v9 = vpack.c.bf16 %v765_v62, %v761_v61  ;;  %v3858_v61 = vpack.c.bf16 %v387_v59, %v380_v57  ;;  %v394_v62 = vld [vmem:[#allocation8 + $0x340] sm:$0xff]  ;;  %v775_v49 = vld [vmem:[#allocation10 + $0x170] sm:$0xff] }
 0x171   :  { %v783_v57 = vld [vmem:[#allocation10 + $0x1b0] sm:$0xff] }
 0x224   :  { %v285_v8 = vpop.f32.mrb[0].mxu1 }
 0x225   :  { %v286_v12 = vadd.f32 %v2892_v4, %v285_v8  ;;  %v3199_v13 = vpop.f32.mrb[1].mxu1  ;;  %v3793_v4 = vpack.c.bf16 %v355_v56, %v348_v55  ;;  %v377_v8 = vld [vmem:[#allocation8 + $0x2b8] sm:$0xff] }
 0x226   :  { %v773_v13 = vld [vmem:[#allocation10 + $0x160] sm:$0xff]  ;;  %v373_v55 = vld [vmem:[#allocation8 + $0x298] sm:$0xff] }
 0x227   :  { %v5056_v17 = vmax.f32 %v286_v12, 0.0  ;;  %v769_v12 = vld [vmem:[#allocation10 + $0x140] sm:$0xff] }
 0x228   :  { %v5091_v23 = vpack.c.bf16 %v773_v13, %v769_v12  ;;  %v744_v12 = vld [vmem:[#allocation10 + $0x78] sm:$0xff] }
 0x229   :  { %504 = vmatmul.mubr.f32.vlgmr.msra.gmra.mrb[2].mxu1 %v5056_v17  ;;  %646 = vmatmul.mubr.f32.vlgmr.msra.gmra.mrb[2].mxu0 %v5056_v17 }
 0x22a   :  { %3778 = vmatpush1.bf16.msra.mxu1 %v3777_v16  ;;  %574 = vmatprep.mubr.f32.mxu1 %v5762_v1  ;;  %v3797_v16 = vpack.c.bf16 %v369_v7, %v362_v6  ;;  %v731_v7 = vld [vmem:[#allocation10 + $0x10] sm:$0xff] }
 0x22b   :  { %3780 = vmatprep.subr.bf16.mxu1 %v3779_v18  ;;  %3866 = vmatpush1.bf16.msra.mxu0 %v5058_v22  ;;  %v3799_v18 = vpack.c.bf16 %v384_v10, %v377_v8  ;;  %v735_v8 = vld [vmem:[#allocation10 + $0x30] sm:$0xff]  ;;  %v740_v10 = vld [vmem:[#allocation10 + $0x58] sm:$0xff] }
 0x22c   :  { %3868 = vmatprep.subr.bf16.mxu0 %v5060_v24  ;;  %889 = vmatprep.mubr.f32.mxu0 %v5762_v1  ;;  %v5114_v13 = vpack.c.bf16 %v735_v8, %v731_v7  ;;  %v5117_v14 = vpack.c.bf16 %v744_v12, %v740_v10  ;;  %v787_v8 = vld [vmem:[#allocation10 + $0x1d0] sm:$0xff] }
 0x22d   :  { %v791_v10 = vld [vmem:[#allocation10 + $0x1f0] sm:$0xff] }
 0x22e   :  { %3782 = vmatpush1.bf16.msra.mxu1 %v3781_v29  ;;  %v3801_v29 = vpack.c.bf16 %v383_v20, %v376_v19  ;;  %v752_v19 = vld [vmem:[#allocation10 + $0xb8] sm:$0xff]  ;;  %v5165_v12 = vpack.c.bf16 %v791_v10, %v787_v8  ;;  %v813_v10 = vld [vmem:[#allocation11 + $0xa0] sm:$0xff] }
 0x22f   :  { %3784 = vmatprep.subr.bf16.mxu1 %v3783_v30  ;;  %3870 = vmatpush1.bf16.msra.mxu0 %v5066_v34  ;;  %v3803_v30 = vpack.c.bf16 %v398_v25, %v391_v21  ;;  %v747_v25 = vld [vmem:[#allocation10 + $0x90] sm:$0xff] }
 0x230   :  { %3872 = vmatprep.subr.bf16.mxu0 %v5069_v36 }
 0x232   :  { %3786 = vmatpush1.bf16.msra.mxu1 %v3785_v41  ;;  %v317_v41 = vld [vmem:[#allocation8 + $0xd8] sm:$0xff] }
 0x233   :  { %3788 = vmatprep.subr.bf16.mxu1 %v3787_v42  ;;  %3874 = vmatpush1.bf16.msra.mxu0 %v5073_v46  ;;  %v3843_v42 = vpack.c.bf16 %v317_v41, %v310_v40  ;;  %v763_v40 = vld [vmem:[#allocation10 + $0x110] sm:$0xff] }
 0x234   :  { %3876 = vmatprep.subr.bf16.mxu0 %v5076_v48  ;;  %v767_v41 = vld [vmem:[#allocation10 + $0x130] sm:$0xff] }
 0x235   :  { %v5140_v44 = vpack.c.bf16 %v767_v41, %v763_v40 }
 0x236   :  { %3790 = vmatpush1.bf16.msra.mxu1 %v3789_v53  ;;  %v3852_v53 = vpack.c.bf16 %v359_v52, %v352_v51  ;;  %v784_v51 = vld [vmem:[#allocation10 + $0x1b8] sm:$0xff]  ;;  %v5146_v52 = vpack.c.bf16 %v775_v49, %v771_v47 }
 0x237   :  { %3792 = vmatprep.subr.bf16.mxu1 %v3791_v54  ;;  %3878 = vmatpush1.bf16.msra.mxu0 %v5079_v58  ;;  %v366_v54 = vld [vmem:[#allocation8 + $0x260] sm:$0xff] }
 0x238   :  { %3880 = vmatprep.subr.bf16.mxu0 %v5082_v60  ;;  %v3855_v56 = vpack.c.bf16 %v373_v55, %v366_v54  ;;  %v786_v54 = vld [vmem:[#allocation10 + $0x1c8] sm:$0xff] }
 0x239   :  { %v790_v55 = vld [vmem:[#allocation10 + $0x1e8] sm:$0xff] }
 0x23a   :  { %3794 = vmatpush1.bf16.msra.mxu1 %v3793_v4  ;;  %v736_v4 = vld [vmem:[#allocation10 + $0x38] sm:$0xff]  ;;  %v5151_v59 = vpack.c.bf16 %v790_v55, %v786_v54 }
 0x23b   :  { %3796 = vmatprep.subr.bf16.mxu1 %v3795_v5  ;;  %3882 = vmatpush1.bf16.msra.mxu0 %v5085_v9  ;;  %v3861_v5 = vpack.c.bf16 %v401_v63, %v394_v62  ;;  %v5112_v6 = vpack.c.bf16 %v736_v4, %v732_v2  ;;  %v789_v62 = vld [vmem:[#allocation10 + $0x1e0] sm:$0xff]  ;;  %v788_v63 = vld [vmem:[#allocation10 + $0x1d8] sm:$0xff] }
 0x23c   :  { %3884 = vmatprep.subr.bf16.mxu0 %v5088_v11  ;;  %v792_v2 = vld [vmem:[#allocation10 + $0x1f8] sm:$0xff] }
 0x23d   :  { %v5161_v7 = vpack.c.bf16 %v792_v2, %v788_v63  ;;  %v811_v63 = vld [vmem:[#allocation11 + $0x90] sm:$0xff]  ;;  %v812_v2 = vld [vmem:[#allocation11 + $0x98] sm:$0xff] }
 0x23e   :  { %3798 = vmatpush1.bf16.msra.mxu1 %v3797_v16  ;;  %v743_v16 = vld [vmem:[#allocation10 + $0x70] sm:$0xff]  ;;  %v5254_v8 = vpack.c.bf16 %v812_v2, %v811_v63 }
 0x23f   :  { %3800 = vmatprep.subr.bf16.mxu1 %v3799_v18  ;;  %3886 = vmatpush1.bf16.msra.mxu0 %v5091_v23  ;;  %v748_v18 = vld [vmem:[#allocation10 + $0x98] sm:$0xff]  ;;  %v5121_v20 = vpack.c.bf16 %v743_v16, %v739_v15  ;;  %v404_v15 = vlaneseq }
 0x240   :  { %3888 = vmatprep.subr.bf16.mxu0 %v5094_v26  ;;  %v5125_v21 = vpack.c.bf16 %v752_v19, %v748_v18  ;;  %v5176_v19 = vld [vmem:[%s5757_s6] sm:$0xff]  ;;  %s4896_s6 = smov [#allocation13]  }
 0x241   :  { %v5170_v16 = vshrl.u32 %v404_v15, 7  ;;  %v814_v15 = vld [vmem:[#allocation11 + $0xa8] sm:$0xff]  ;;  %s2878_s23 = sshll.u32 %s4896_s6, 4  ;;  %s2879_s23 = int_to_ptr.vmem [resolvable:$true] %s2878_s23 }
 0x242   :  { %3802 = vmatpush1.bf16.msra.mxu1 %v3801_v29  ;;  %v760_v29 = vld [vmem:[#allocation10 + $0xf8] sm:$0xff]  ;;  %s4849_s25 = scalar_lea.vmem %s2879_s23, 896  ;;  %p4854_p7 = scmp.lt.s32.totalorder %s2879_s23, %s2879_s23 }
 0x243   :  { %3804 = vmatprep.subr.bf16.mxu1 %v3803_v30  ;;  %3890 = vmatpush1.bf16.msra.mxu0 %v5097_v33  ;;  %v5128_v30 = vpack.c.bf16 %v751_v27, %v747_v25  ;;  %v406_v18 = vsub.s32 0, %v5170_v16  ;;  %v414_v49 = vsub.s32 2, %v5170_v16  ;;  %p4850_p6 = scmp.ne.s32.totalorder %s2879_s23, %s4849_s25  ;;  %p4855_p8 = scmp.lt.s32.totalorder %s4849_s25, %s4849_s25 }
 0x244   :  { %3892 = vmatprep.subr.bf16.mxu0 %v5151_v59 }
 0x245   :  { %v407_v25 = vrot.slane %v5176_v19, %v406_v18  ;;  %v5260_v18 = vpack.c.bf16 %v814_v15, %v813_v10  ;;  %v793_v10 = vld [vmem:[#allocation11] sm:$0xff]  ;;  %v794_v15 = vld [vmem:[#allocation11 + $0x8] sm:$0xff]  ;;  %p4856_p9 = por %p4855_p8, %p4854_p7 }
 0x246   :  { %3806 = vmatpush1.bf16.msra.mxu1 %v3805_v35  ;;  %v764_v35 = vld [vmem:[#allocation10 + $0x118] sm:$0xff] }
 0x247   :  { %3839 = vmatprep.subr.bf16.mxu1 %v4893_v0  ;;  %p4857_p10 = pnand %p4856_p9, %p4850_p6 }
 0x249   :  { %575 = vmatmul.mubr.f32.vlgmr.msra.gmra.mrb[4].mxu1 %v5056_v17 }
 0x24a   :  { %3841 = vmatpush3.bf16.msra.mxu1 %v3840_v39  ;;  %3232 = vmatprep.mubr.msk.f32.mxu1 %vm4894_vm0, %v5762_v1  ;;  %v5137_v39 = vpack.c.bf16 %v768_v37, %v764_v35  ;;  %v410_v37 = vsub.s32 1, %v5170_v16 }
 0x24b   :  { %3842 = vmatprep.subr.bf16.mxu1 %v4893_v0 }
 0x24c   :  { %v411_v40 = vrot.slane %v5176_v19, %v410_v37 }
 0x24e   :  { %3844 = vmatpush3.bf16.msra.mxu1 %v3843_v42  ;;  %v772_v42 = vld [vmem:[#allocation10 + $0x158] sm:$0xff] }
 0x24f   :  { %3845 = vmatprep.subr.bf16.mxu1 %v4893_v0 }
 0x252   :  { %3847 = vmatpush3.bf16.msra.mxu1 %v3846_v45  ;;  %v5143_v45 = vpack.c.bf16 %v776_v43, %v772_v42 }
 0x253   :  { %3848 = vmatprep.subr.bf16.mxu1 %v4893_v0 }
 0x256   :  { %3850 = vmatpush3.bf16.msra.mxu1 %v3849_v50  ;;  %v780_v50 = vld [vmem:[#allocation10 + $0x198] sm:$0xff] }
 0x257   :  { %3851 = vmatprep.subr.bf16.mxu1 %v4893_v0 }
 0x25a   :  { %3853 = vmatpush3.bf16.msra.mxu1 %v3852_v53  ;;  %v779_v53 = vld [vmem:[#allocation10 + $0x190] sm:$0xff] }
 0x25b   :  { %3854 = vmatprep.subr.bf16.mxu1 %v4893_v0 }
 0x25e   :  { %3856 = vmatpush3.bf16.msra.mxu1 %v3855_v56  ;;  %v5149_v56 = vpack.c.bf16 %v784_v51, %v780_v50  ;;  %v415_v50 = vrot.slane %v5176_v19, %v414_v49  ;;  %v822_v49 = vld [vmem:[#allocation11 + $0xe8] sm:$0xff] }
 0x25f   :  { %3857 = vmatprep.subr.bf16.mxu1 %v4893_v0 }
 0x262   :  { %3859 = vmatpush3.bf16.msra.mxu1 %v3858_v61  ;;  %v785_v61 = vld [vmem:[#allocation10 + $0x1c0] sm:$0xff] }
 0x263   :  { %3860 = vmatprep.subr.bf16.mxu1 %v4893_v0  ;;  %v5153_v4 = vpack.c.bf16 %v789_v62, %v785_v61  ;;  %v810_v61 = vld [vmem:[#allocation11 + $0x88] sm:$0xff] }
 0x265   :  { %3894 = vmatpush1.bf16.msra.mxu0 %v5153_v4 }
 0x266   :  { %3862 = vmatpush3.bf16.msra.mxu1 %v3861_v5  ;;  %v5157_v5 = vpack.c.bf16 %v783_v57, %v779_v53  ;;  %3960 = vmatprep.subr.bf16.mxu0 %v5112_v6  ;;  %v809_v57 = vld [vmem:[#allocation11 + $0x80] sm:$0xff] }
 0x267   :  { %3896 = vmatprep.subr.bf16.mxu1 %v5112_v6  ;;  %v5251_v62 = vpack.c.bf16 %v810_v61, %v809_v57  ;;  %v824_v57 = vld [vmem:[#allocation11 + $0xf8] sm:$0xff] }
 0x269   :  { %3233 = vmatmul.mubr.f32.vlgmr.msra.gmra.mrb[6].mxu1 %v5056_v17  ;;  %v5131_v17 = vpack.c.bf16 %v760_v29, %v756_v28 }
 0x26a   :  { %3898 = vmatpush1.bf16.msra.mxu1 %v5114_v13  ;;  %959 = vmatprep.mubr.f32.mxu1 %v5762_v1 }
 0x26b   :  { %3900 = vmatprep.subr.bf16.mxu1 %v5117_v14 }
 0x26e   :  { %3902 = vmatpush1.bf16.msra.mxu1 %v5121_v20 }
 0x26f   :  { %3904 = vmatprep.subr.bf16.mxu1 %v5125_v21 }
 0x272   :  { %3906 = vmatpush1.bf16.msra.mxu1 %v5128_v30 }
 0x273   :  { %3908 = vmatprep.subr.bf16.mxu1 %v5131_v17 }
 0x276   :  { %3910 = vmatpush1.bf16.msra.mxu1 %v5134_v38 }
 0x277   :  { %3912 = vmatprep.subr.bf16.mxu1 %v5137_v39 }
 0x27a   :  { %3914 = vmatpush1.bf16.msra.mxu1 %v5140_v44 }
 0x27b   :  { %3916 = vmatprep.subr.bf16.mxu1 %v5143_v45 }
 0x27e   :  { %3918 = vmatpush1.bf16.msra.mxu1 %v5146_v52 }
 0x27f   :  { %3920 = vmatprep.subr.bf16.mxu1 %v5149_v56 }
 0x282   :  { %3922 = vmatpush1.bf16.msra.mxu1 %v5157_v5 }
 0x283   :  { %3924 = vmatprep.subr.bf16.mxu1 %v5161_v7 }
 0x286   :  { %3926 = vmatpush1.bf16.msra.mxu1 %v5165_v12 }
 0x287   :  { %3928 = vmatprep.subr.bf16.mxu1 %v5050_v3 }
 0x2fc   :  { %v505_v27 = vpop.f32.mrb[2].mxu1  ;;  %v5179_v28 = vpop.f32.mrb[2].mxu0 }
 0x2fd   :  { %v506_v29 = vadd.f32 %v505_v27, %v407_v25  ;;  %v507_v31 = vpop.f32.mrb[3].mxu1  ;;  %v5181_v32 = vpop.f32.mrb[3].mxu0  ;;  %v815_v25 = vld [vmem:[#allocation11 + $0xb0] sm:$0xff]  ;;  %v816_v27 = vld [vmem:[#allocation11 + $0xb8] sm:$0xff] }
 0x2fe   :  { %5765 = vst [vmem:[#allocation19_spill] sm:$0xff] %v5181_v32  ;;  %v508_v41 = vadd.f32 %v507_v31, %v411_v40  ;;  %v817_v31 = vld [vmem:[#allocation11 + $0xc0] sm:$0xff]  ;;  %v819_v40 = vld [vmem:[#allocation11 + $0xd0] sm:$0xff] }
 0x2ff   :  { %v722_v35 = vmax.f32 %v506_v29, 0.0  ;;  %v5266_v29 = vpack.c.bf16 %v816_v27, %v815_v25  ;;  %v5299_v27 = vpack.c.bf16 %v794_v15, %v793_v10  ;;  %v800_v10 = vld [vmem:[#allocation11 + $0x38] sm:$0xff] }
 0x300   :  { %v723_v47 = vmax.f32 %v508_v41, 0.0  ;;  %v820_v41 = vld [vmem:[#allocation11 + $0xd8] sm:$0xff] }
 0x301   :  { %890 = vmatmul.mubr.f32.vlgmr.msra.gmra.mrb[4].mxu0 %v722_v35  ;;  %960 = vmatmul.mubr.f32.vlgmr.msra.gmra.mrb[8].mxu1 %v722_v35  ;;  %v818_v35 = vld [vmem:[#allocation11 + $0xc8] sm:$0xff] }
 0x302   :  { %3930 = vmatpush1.bf16.msra.mxu1 %v5058_v22  ;;  %3962 = vmatpush1.bf16.msra.mxu0 %v5114_v13  ;;  %v5272_v37 = vpack.c.bf16 %v818_v35, %v817_v31 }
 0x303   :  { %3932 = vmatprep.subr.bf16.mxu1 %v5060_v24  ;;  %3964 = vmatprep.subr.bf16.mxu0 %v5117_v14 }
 0x304   :  { %1030 = vmatprep.mubr.f32.mxu1 %v5762_v1  ;;  %1101 = vmatprep.mubr.f32.mxu0 %v5762_v1 }
 0x306   :  { %3934 = vmatpush1.bf16.msra.mxu1 %v5066_v34  ;;  %3966 = vmatpush1.bf16.msra.mxu0 %v5121_v20 }
 0x307   :  { %3936 = vmatprep.subr.bf16.mxu1 %v5069_v36  ;;  %3968 = vmatprep.subr.bf16.mxu0 %v5125_v21 }
 0x30a   :  { %3938 = vmatpush1.bf16.msra.mxu1 %v5073_v46  ;;  %3970 = vmatpush1.bf16.msra.mxu0 %v5128_v30 }
 0x30b   :  { %3940 = vmatprep.subr.bf16.mxu1 %v5076_v48  ;;  %3972 = vmatprep.subr.bf16.mxu0 %v5131_v17 }
 0x30e   :  { %3942 = vmatpush1.bf16.msra.mxu1 %v5079_v58  ;;  %3974 = vmatpush1.bf16.msra.mxu0 %v5134_v38 }
 0x30f   :  { %3944 = vmatprep.subr.bf16.mxu1 %v5082_v60  ;;  %3976 = vmatprep.subr.bf16.mxu0 %v5137_v39 }
 0x312   :  { %3946 = vmatpush1.bf16.msra.mxu1 %v5085_v9  ;;  %3978 = vmatpush1.bf16.msra.mxu0 %v5140_v44 }
 0x313   :  { %3948 = vmatprep.subr.bf16.mxu1 %v5088_v11  ;;  %3980 = vmatprep.subr.bf16.mxu0 %v5143_v45 }
 0x316   :  { %3950 = vmatpush1.bf16.msra.mxu1 %v5091_v23  ;;  %3982 = vmatpush1.bf16.msra.mxu0 %v5146_v52 }
 0x317   :  { %3952 = vmatprep.subr.bf16.mxu1 %v5094_v26  ;;  %3984 = vmatprep.subr.bf16.mxu0 %v5149_v56 }
 0x31a   :  { %3954 = vmatpush1.bf16.msra.mxu1 %v5097_v33  ;;  %3986 = vmatpush1.bf16.msra.mxu0 %v5157_v5 }
 0x31b   :  { %3956 = vmatprep.subr.bf16.mxu1 %v5151_v59  ;;  %3988 = vmatprep.subr.bf16.mxu0 %v5161_v7 }
 0x31c   :  { %v576_v42 = vpop.f32.mrb[4].mxu1 }
 0x31d   :  { %v5215_v43 = vpop.f32.mrb[5].mxu1  ;;  %v5239_v51 = vadd.f32 %v576_v42, %v415_v50  ;;  %v5278_v42 = vpack.c.bf16 %v820_v41, %v819_v40  ;;  %v795_v40 = vld [vmem:[#allocation11 + $0x10] sm:$0xff]  ;;  %v796_v41 = vld [vmem:[#allocation11 + $0x18] sm:$0xff] }
 0x31e   :  { %3958 = vmatpush1.bf16.msra.mxu1 %v5153_v4  ;;  %3990 = vmatpush1.bf16.msra.mxu0 %v5165_v12 }
 0x31f   :  { %4072 = vmatprep.subr.bf16.mxu1 %v5112_v6  ;;  %3991 = vmatprep.subr.bf16.mxu0 %v4893_v0  ;;  %v5761_v55 = vmax.f32 %v5239_v51, 0.0 }
 0x321   :  { %1031 = vmatmul.mubr.f32.vlgmr.msra.gmra.mrb[8].mxu1 %v723_v47  ;;  %1102 = vmatmul.mubr.f32.vlgmr.msra.gmra.mrb[6].mxu0 %v723_v47  ;;  %v821_v47 = vld [vmem:[#allocation11 + $0xe0] sm:$0xff] }
 0x322   :  { %4074 = vmatpush1.bf16.msra.mxu1 %v5114_v13  ;;  %1393 = vmatprep.mubr.f32.mxu1 %v5762_v1  ;;  %v5284_v50 = vpack.c.bf16 %v822_v49, %v821_v47  ;;  %v5304_v47 = vpack.c.bf16 %v796_v41, %v795_v40  ;;  %v797_v49 = vld [vmem:[#allocation11 + $0x20] sm:$0xff]  ;;  %v803_v41 = vld [vmem:[#allocation11 + $0x50] sm:$0xff] }
 0x323   :  { %4076 = vmatprep.subr.bf16.mxu1 %v5117_v14  ;;  %3267 = vmatprep.mubr.msk.f32.mxu0 %vm4894_vm0, %v5762_v1 }
 0x324   :  { %3993 = vmatpush3.bf16.msra.mxu0 %v5251_v62 }
 0x325   :  { %3994 = vmatprep.subr.bf16.mxu0 %v4893_v0 }
 0x326   :  { %4078 = vmatpush1.bf16.msra.mxu1 %v5121_v20 }
 0x327   :  { %4080 = vmatprep.subr.bf16.mxu1 %v5125_v21 }
 0x328   :  { %3996 = vmatpush3.bf16.msra.mxu0 %v5254_v8 }
 0x329   :  { %3997 = vmatprep.subr.bf16.mxu0 %v4893_v0 }
 0x32a   :  { %4082 = vmatpush1.bf16.msra.mxu1 %v5128_v30 }
 0x32b   :  { %4084 = vmatprep.subr.bf16.mxu1 %v5131_v17 }
 0x32c   :  { %3999 = vmatpush3.bf16.msra.mxu0 %v5260_v18 }
 0x32d   :  { %4000 = vmatprep.subr.bf16.mxu0 %v4893_v0 }
 0x32e   :  { %4086 = vmatpush1.bf16.msra.mxu1 %v5134_v38 }
 0x32f   :  { %4088 = vmatprep.subr.bf16.mxu1 %v5137_v39 }
 0x330   :  { %4002 = vmatpush3.bf16.msra.mxu0 %v5266_v29 }
 0x331   :  { %4003 = vmatprep.subr.bf16.mxu0 %v4893_v0 }
 0x332   :  { %4090 = vmatpush1.bf16.msra.mxu1 %v5140_v44 }
 0x333   :  { %4092 = vmatprep.subr.bf16.mxu1 %v5143_v45 }
 0x334   :  { %4005 = vmatpush3.bf16.msra.mxu0 %v5272_v37 }
 0x335   :  { %4006 = vmatprep.subr.bf16.mxu0 %v4893_v0 }
 0x336   :  { %4094 = vmatpush1.bf16.msra.mxu1 %v5146_v52 }
 0x337   :  { %4096 = vmatprep.subr.bf16.mxu1 %v5149_v56 }
 0x338   :  { %4008 = vmatpush3.bf16.msra.mxu0 %v5278_v42 }
 0x339   :  { %4009 = vmatprep.subr.bf16.mxu0 %v4893_v0 }
 0x33a   :  { %4098 = vmatpush1.bf16.msra.mxu1 %v5157_v5 }
 0x33b   :  { %4100 = vmatprep.subr.bf16.mxu1 %v5161_v7 }
 0x33c   :  { %v5242_v53 = vpop.f32.mrb[6].mxu1  ;;  %4011 = vmatpush3.bf16.msra.mxu0 %v5284_v50 }
 0x33d   :  { %5766 = vst [vmem:[#allocation20_spill] sm:$0xff] %v5242_v53  ;;  %v3234_v54 = vpop.f32.mrb[7].mxu1  ;;  %4012 = vmatprep.subr.bf16.mxu0 %v4893_v0 }
 0x33e   :  { %4102 = vmatpush1.bf16.msra.mxu1 %v5165_v12  ;;  %v823_v54 = vld [vmem:[#allocation11 + $0xf0] sm:$0xff] }
 0x33f   :  { %4103 = vmatprep.subr.bf16.mxu1 %v4893_v0  ;;  %v5290_v61 = vpack.c.bf16 %v824_v57, %v823_v54  ;;  %v798_v54 = vld [vmem:[#allocation11 + $0x28] sm:$0xff] }
 0x340   :  { %v5310_v57 = vpack.c.bf16 %v798_v54, %v797_v49  ;;  %v804_v49 = vld [vmem:[#allocation11 + $0x58] sm:$0xff] }
 0x341   :  { %1394 = vmatmul.mubr.f32.vlgmr.msra.gmra.mrb[10].mxu1 %v5761_v55  ;;  %4014 = vmatpush3.bf16.msra.mxu0 %v5290_v61  ;;  %v5322_v54 = vpack.c.bf16 %v804_v49, %v803_v41  ;;  %v5767_v49 = vmov 0.0  }
 0x342   :  { %3337 = vmatprep.mubr.msk.f32.mxu1 %vm4894_vm0, %v5762_v1  ;;  %4105 = vmatpush3.bf16.msra.mxu1 %v5251_v62 }
 0x343   :  { %4106 = vmatprep.subr.bf16.mxu1 %v4893_v0  ;;  %4015 = vmatprep.subr.bf16.mxu0 %v4893_v0 }
 0x346   :  { %4108 = vmatpush3.bf16.msra.mxu1 %v5254_v8 }
 0x347   :  { %4109 = vmatprep.subr.bf16.mxu1 %v4893_v0 }
 0x34a   :  { %4111 = vmatpush3.bf16.msra.mxu1 %v5260_v18 }
 0x34b   :  { %4112 = vmatprep.subr.bf16.mxu1 %v4893_v0 }
 0x34e   :  { %4114 = vmatpush3.bf16.msra.mxu1 %v5266_v29 }
 0x34f   :  { %4115 = vmatprep.subr.bf16.mxu1 %v4893_v0 }
 0x352   :  { %4117 = vmatpush3.bf16.msra.mxu1 %v5272_v37 }
 0x353   :  { %4118 = vmatprep.subr.bf16.mxu1 %v4893_v0 }
 0x356   :  { %4120 = vmatpush3.bf16.msra.mxu1 %v5278_v42 }
 0x357   :  { %4121 = vmatprep.subr.bf16.mxu1 %v4893_v0 }
 0x35a   :  { %4123 = vmatpush3.bf16.msra.mxu1 %v5284_v50 }
 0x35b   :  { %4124 = vmatprep.subr.bf16.mxu1 %v4893_v0 }
 0x35e   :  { %4126 = vmatpush3.bf16.msra.mxu1 %v5290_v61 }
 0x35f   :  { %4127 = vmatprep.subr.bf16.mxu1 %v4893_v0 }
 0x3d4   :  { %v891_v63 = vpop.f32.mrb[4].mxu0 }
 0x3d5   :  { %v892_v2 = vpop.f32.mrb[5].mxu0  ;;  %v799_v63 = vld [vmem:[#allocation11 + $0x30] sm:$0xff] }
 0x3d6   :  { %v5314_v15 = vpack.c.bf16 %v800_v10, %v799_v63  ;;  %v805_v63 = vld [vmem:[#allocation11 + $0x60] sm:$0xff]  ;;  %v806_v10 = vld [vmem:[#allocation11 + $0x68] sm:$0xff]  ;;  %v1109_v41 = vmax.f32 %v892_v2, 0.0  ;;  %v5768_v2 = vmax.f32 %v5239_v51, 0.0  ;;  %v418_v51 = vsub.s32 3, %v5170_v16 }
 0x3d7   :  { %v5326_v55 = vpack.c.bf16 %v806_v10, %v805_v63 }
 0x3d8   :  { %v419_v63 = vrot.slane %v5176_v19, %v418_v51 }
 0x3da   :  { %v5371_v10 = vadd.f32 %v5215_v43, %v419_v63 }
 0x3f4   :  { %v1032_v25 = vpop.f32.mrb[8].mxu1 }
 0x3f5   :  { %v1110_v31 = vmax.f32 %v1032_v25, 0.0  ;;  %v5301_v35 = vpop.f32.mrb[9].mxu1  ;;  %v801_v25 = vld [vmem:[#allocation11 + $0x40] sm:$0xff] }
 0x3f7   :  { %3268 = vmatmul.mubr.f32.vlgmr.msra.gmra.mrb[8].mxu0 %v1110_v31  ;;  %v802_v31 = vld [vmem:[#allocation11 + $0x48] sm:$0xff] }
 0x3f8   :  { %4017 = vmatpush3.bf16.msra.mxu0 %v5299_v27  ;;  %3302 = vmatprep.mubr.msk.f32.mxu0 %vm4894_vm0, %v5762_v1  ;;  %v5318_v40 = vpack.c.bf16 %v802_v31, %v801_v25  ;;  %v807_v25 = vld [vmem:[#allocation11 + $0x70] sm:$0xff]  ;;  %v808_v31 = vld [vmem:[#allocation11 + $0x78] sm:$0xff] }
 0x3f9   :  { %4018 = vmatprep.subr.bf16.mxu0 %v4893_v0  ;;  %v5330_v1 = vpack.c.bf16 %v808_v31, %v807_v25  ;;  %v5764_v25 = vmax.f32 %v5371_v10, 0.0 }
 0x3fc   :  { %4020 = vmatpush3.bf16.msra.mxu0 %v5304_v47 }
 0x3fd   :  { %4021 = vmatprep.subr.bf16.mxu0 %v4893_v0 }
 0x400   :  { %4023 = vmatpush3.bf16.msra.mxu0 %v5310_v57 }
 0x401   :  { %4024 = vmatprep.subr.bf16.mxu0 %v4893_v0 }
 0x404   :  { %4026 = vmatpush3.bf16.msra.mxu0 %v5314_v15 }
 0x405   :  { %4027 = vmatprep.subr.bf16.mxu0 %v4893_v0 }
 0x408   :  { %4029 = vmatpush3.bf16.msra.mxu0 %v5318_v40 }
 0x409   :  { %4030 = vmatprep.subr.bf16.mxu0 %v4893_v0 }
 0x40c   :  { %4032 = vmatpush3.bf16.msra.mxu0 %v5322_v54 }
 0x40d   :  { %4033 = vmatprep.subr.bf16.mxu0 %v4893_v0 }
 0x410   :  { %4035 = vmatpush3.bf16.msra.mxu0 %v5326_v55 }
 0x411   :  { %4036 = vmatprep.subr.bf16.mxu0 %v4893_v0 }
 0x414   :  { %4038 = vmatpush3.bf16.msra.mxu0 %v5330_v1 }
 0x415   :  { %4040 = vmatprep.subr.bf16.mxu0 %v5050_v3 }
 0x417   :  { %3303 = vmatmul.mubr.f32.vlgmr.msra.gmra.mrb[8].mxu0 %v1109_v41 }
 0x418   :  { %4042 = vmatpush1.bf16.msra.mxu0 %v5058_v22  ;;  %1322 = vmatprep.mubr.f32.mxu0 %v5767_v49 }
 0x419   :  { %4044 = vmatprep.subr.bf16.mxu0 %v5060_v24 }
 0x41c   :  { %4046 = vmatpush1.bf16.msra.mxu0 %v5066_v34 }
 0x41d   :  { %4048 = vmatprep.subr.bf16.mxu0 %v5069_v36 }
 0x420   :  { %4050 = vmatpush1.bf16.msra.mxu0 %v5073_v46 }
 0x421   :  { %4052 = vmatprep.subr.bf16.mxu0 %v5076_v48 }
 0x424   :  { %4054 = vmatpush1.bf16.msra.mxu0 %v5079_v58 }
 0x425   :  { %4056 = vmatprep.subr.bf16.mxu0 %v5082_v60 }
 0x428   :  { %4058 = vmatpush1.bf16.msra.mxu0 %v5085_v9 }
 0x429   :  { %4060 = vmatprep.subr.bf16.mxu0 %v5088_v11 }
 0x42c   :  { %4062 = vmatpush1.bf16.msra.mxu0 %v5091_v23 }
 0x42d   :  { %4064 = vmatprep.subr.bf16.mxu0 %v5094_v26 }
 0x430   :  { %4066 = vmatpush1.bf16.msra.mxu0 %v5097_v33 }
 0x431   :  { %4068 = vmatprep.subr.bf16.mxu0 %v5151_v59 }
 0x434   :  { %4070 = vmatpush1.bf16.msra.mxu0 %v5153_v4 }
 0x435   :  { %4184 = vmatprep.subr.bf16.mxu0 %v5112_v6 }
 0x437   :  { %1323 = vmatmul.mubr.f32.vlgmr.msra.gmra.mrb[6].mxu0 %v5768_v2 }
 0x438   :  { %4186 = vmatpush1.bf16.msra.mxu0 %v5114_v13  ;;  %1686 = vmatprep.mubr.f32.mxu0 %v5767_v49 }
 0x439   :  { %4188 = vmatprep.subr.bf16.mxu0 %v5117_v14 }
 0x43c   :  { %4190 = vmatpush1.bf16.msra.mxu0 %v5121_v20 }
 0x43d   :  { %4192 = vmatprep.subr.bf16.mxu0 %v5125_v21 }
 0x440   :  { %4194 = vmatpush1.bf16.msra.mxu0 %v5128_v30 }
 0x441   :  { %4196 = vmatprep.subr.bf16.mxu0 %v5131_v17 }
 0x444   :  { %4198 = vmatpush1.bf16.msra.mxu0 %v5134_v38 }
 0x445   :  { %4200 = vmatprep.subr.bf16.mxu0 %v5137_v39 }
 0x448   :  { %4202 = vmatpush1.bf16.msra.mxu0 %v5140_v44 }
 0x449   :  { %4204 = vmatprep.subr.bf16.mxu0 %v5143_v45 }
 0x44c   :  { %4206 = vmatpush1.bf16.msra.mxu0 %v5146_v52 }
 0x44d   :  { %4208 = vmatprep.subr.bf16.mxu0 %v5149_v56 }
 0x450   :  { %4210 = vmatpush1.bf16.msra.mxu0 %v5157_v5 }
 0x451   :  { %4212 = vmatprep.subr.bf16.mxu0 %v5161_v7 }
 0x454   :  { %4214 = vmatpush1.bf16.msra.mxu0 %v5165_v12 }
 0x455   :  { %4215 = vmatprep.subr.bf16.mxu0 %v4893_v0 }
 0x457   :  { %1687 = vmatmul.mubr.f32.vlgmr.msra.gmra.mrb[10].mxu0 %v5764_v25 }
 0x458   :  { %4217 = vmatpush3.bf16.msra.mxu0 %v5251_v62  ;;  %3407 = vmatprep.mubr.msk.f32.mxu0 %vm4894_vm0, %v5767_v49 }
 0x459   :  { %4218 = vmatprep.subr.bf16.mxu0 %v4893_v0 }
 0x45c   :  { %4220 = vmatpush3.bf16.msra.mxu0 %v5254_v8 }
 0x45d   :  { %4221 = vmatprep.subr.bf16.mxu0 %v4893_v0 }
 0x460   :  { %4223 = vmatpush3.bf16.msra.mxu0 %v5260_v18 }
 0x461   :  { %4224 = vmatprep.subr.bf16.mxu0 %v4893_v0 }
 0x464   :  { %4226 = vmatpush3.bf16.msra.mxu0 %v5266_v29 }
 0x465   :  { %4227 = vmatprep.subr.bf16.mxu0 %v4893_v0 }
 0x468   :  { %4229 = vmatpush3.bf16.msra.mxu0 %v5272_v37 }
 0x469   :  { %4230 = vmatprep.subr.bf16.mxu0 %v4893_v0 }
 0x46c   :  { %4232 = vmatpush3.bf16.msra.mxu0 %v5278_v42 }
 0x46d   :  { %4233 = vmatprep.subr.bf16.mxu0 %v4893_v0 }
 0x470   :  { %4235 = vmatpush3.bf16.msra.mxu0 %v5284_v50 }
 0x471   :  { %4236 = vmatprep.subr.bf16.mxu0 %v4893_v0 }
 0x474   :  { %4238 = vmatpush3.bf16.msra.mxu0 %v5290_v61 }
 0x475   :  { %4239 = vmatprep.subr.bf16.mxu0 %v4893_v0 }
 0x4ea   :  { %v1247_v43 = vpop.f32.mrb[8].mxu0 }
 0x4eb   :  { %v2894_v31 = vmul.f32 -1.442695, %v1247_v43  ;;  %v3304_v41 = vpop.f32.mrb[9].mxu0 }
 0x4ed   :  { %4689 = vpow2.f32 %v2894_v31 }
 0x4f7   :  { %v4690_v2 = vpop.eup %4689 }
 0x4f8   :  { %v1254_v51 = vadd.f32 1.0, %v4690_v2 }
 0x4fa   :  { %4691 = vrcp.f32 %v1254_v51 }
 0x504   :  { %v4692_v63 = vpop.eup %4691 }
 0x505   :  { %1257 = vst [vmem:[#allocation13] sm:$0xff] %v4692_v63 }
 0x50a   :  { %v1324_v25 = vpop.f32.mrb[6].mxu0 }
 0x50b   :  { %v1403_v53 = vmax.f32 %v1324_v25, 0.0  ;;  %v5397_v32 = vpop.f32.mrb[7].mxu0 }
 0x50d   :  { %3338 = vmatmul.mubr.f32.vlgmr.msra.gmra.mrb[12].mxu1 %v1403_v53  ;;  %v1402_v53 = vmax.f32 %v5301_v35, 0.0  ;;  %v5769_v35 = vmax.f32 %v5371_v10, 0.0  ;;  %v422_v10 = vsub.s32 4, %v5170_v16 }
 0x50e   :  { %4129 = vmatpush3.bf16.msra.mxu1 %v5299_v27  ;;  %3372 = vmatprep.mubr.msk.f32.mxu1 %vm4894_vm0, %v5767_v49 }
 0x50f   :  { %4130 = vmatprep.subr.bf16.mxu1 %v4893_v0  ;;  %v423_v25 = vrot.slane %v5176_v19, %v422_v10 }
 0x511   :  { %v5454_v43 = vadd.f32 %v5179_v28, %v423_v25 }
 0x512   :  { %4132 = vmatpush3.bf16.msra.mxu1 %v5304_v47 }
 0x513   :  { %4133 = vmatprep.subr.bf16.mxu1 %v4893_v0  ;;  %v726_v31 = vmax.f32 %v5454_v43, 0.0 }
 0x516   :  { %4135 = vmatpush3.bf16.msra.mxu1 %v5310_v57 }
 0x517   :  { %4136 = vmatprep.subr.bf16.mxu1 %v4893_v0 }
 0x51a   :  { %4138 = vmatpush3.bf16.msra.mxu1 %v5314_v15 }
 0x51b   :  { %4139 = vmatprep.subr.bf16.mxu1 %v4893_v0 }
 0x51e   :  { %4141 = vmatpush3.bf16.msra.mxu1 %v5318_v40 }
 0x51f   :  { %4142 = vmatprep.subr.bf16.mxu1 %v4893_v0 }
 0x522   :  { %4144 = vmatpush3.bf16.msra.mxu1 %v5322_v54 }
 0x523   :  { %4145 = vmatprep.subr.bf16.mxu1 %v4893_v0 }
 0x526   :  { %4147 = vmatpush3.bf16.msra.mxu1 %v5326_v55 }
 0x527   :  { %4148 = vmatprep.subr.bf16.mxu1 %v4893_v0 }
 0x52a   :  { %4150 = vmatpush3.bf16.msra.mxu1 %v5330_v1 }
 0x52b   :  { %4152 = vmatprep.subr.bf16.mxu1 %v5050_v3 }
 0x52d   :  { %3373 = vmatmul.mubr.f32.vlgmr.msra.gmra.mrb[12].mxu1 %v1402_v53 }
 0x52e   :  { %4154 = vmatpush1.bf16.msra.mxu1 %v5058_v22  ;;  %1615 = vmatprep.mubr.f32.mxu1 %v5767_v49 }
 0x52f   :  { %4156 = vmatprep.subr.bf16.mxu1 %v5060_v24 }
 0x532   :  { %4158 = vmatpush1.bf16.msra.mxu1 %v5066_v34 }
 0x533   :  { %4160 = vmatprep.subr.bf16.mxu1 %v5069_v36 }
 0x536   :  { %4162 = vmatpush1.bf16.msra.mxu1 %v5073_v46 }
 0x537   :  { %4164 = vmatprep.subr.bf16.mxu1 %v5076_v48 }
 0x53a   :  { %4166 = vmatpush1.bf16.msra.mxu1 %v5079_v58 }
 0x53b   :  { %4168 = vmatprep.subr.bf16.mxu1 %v5082_v60 }
 0x53e   :  { %4170 = vmatpush1.bf16.msra.mxu1 %v5085_v9 }
 0x53f   :  { %4172 = vmatprep.subr.bf16.mxu1 %v5088_v11 }
 0x542   :  { %4174 = vmatpush1.bf16.msra.mxu1 %v5091_v23 }
 0x543   :  { %4176 = vmatprep.subr.bf16.mxu1 %v5094_v26 }
 0x546   :  { %4178 = vmatpush1.bf16.msra.mxu1 %v5097_v33 }
 0x547   :  { %4180 = vmatprep.subr.bf16.mxu1 %v5151_v59 }
 0x54a   :  { %4182 = vmatpush1.bf16.msra.mxu1 %v5153_v4 }
 0x54b   :  { %4296 = vmatprep.subr.bf16.mxu1 %v5112_v6 }
 0x54d   :  { %1616 = vmatmul.mubr.f32.vlgmr.msra.gmra.mrb[10].mxu1 %v5769_v35 }
 0x54e   :  { %4298 = vmatpush1.bf16.msra.mxu1 %v5114_v13  ;;  %1979 = vmatprep.mubr.f32.mxu1 %v5767_v49 }
 0x54f   :  { %4300 = vmatprep.subr.bf16.mxu1 %v5117_v14 }
 0x552   :  { %4302 = vmatpush1.bf16.msra.mxu1 %v5121_v20 }
 0x553   :  { %4304 = vmatprep.subr.bf16.mxu1 %v5125_v21 }
 0x556   :  { %4306 = vmatpush1.bf16.msra.mxu1 %v5128_v30 }
 0x557   :  { %4308 = vmatprep.subr.bf16.mxu1 %v5131_v17 }
 0x55a   :  { %4310 = vmatpush1.bf16.msra.mxu1 %v5134_v38 }
 0x55b   :  { %4312 = vmatprep.subr.bf16.mxu1 %v5137_v39 }
 0x55e   :  { %4314 = vmatpush1.bf16.msra.mxu1 %v5140_v44 }
 0x55f   :  { %4316 = vmatprep.subr.bf16.mxu1 %v5143_v45 }
 0x562   :  { %4318 = vmatpush1.bf16.msra.mxu1 %v5146_v52 }
 0x563   :  { %4320 = vmatprep.subr.bf16.mxu1 %v5149_v56 }
 0x566   :  { %4322 = vmatpush1.bf16.msra.mxu1 %v5157_v5 }
 0x567   :  { %4324 = vmatprep.subr.bf16.mxu1 %v5161_v7 }
 0x56a   :  { %4326 = vmatpush1.bf16.msra.mxu1 %v5165_v12 }
 0x56b   :  { %4327 = vmatprep.subr.bf16.mxu1 %v4893_v0 }
 0x56d   :  { %1980 = vmatmul.mubr.f32.vlgmr.msra.gmra.mrb[14].mxu1 %v726_v31 }
 0x56e   :  { %4329 = vmatpush3.bf16.msra.mxu1 %v5251_v62  ;;  %3477 = vmatprep.mubr.msk.f32.mxu1 %vm4894_vm0, %v5767_v49 }
 0x56f   :  { %4330 = vmatprep.subr.bf16.mxu1 %v4893_v0 }
 0x572   :  { %4332 = vmatpush3.bf16.msra.mxu1 %v5254_v8 }
 0x573   :  { %4333 = vmatprep.subr.bf16.mxu1 %v4893_v0 }
 0x576   :  { %4335 = vmatpush3.bf16.msra.mxu1 %v5260_v18 }
 0x577   :  { %4336 = vmatprep.subr.bf16.mxu1 %v4893_v0 }
 0x57a   :  { %4338 = vmatpush3.bf16.msra.mxu1 %v5266_v29 }
 0x57b   :  { %4339 = vmatprep.subr.bf16.mxu1 %v4893_v0 }
 0x57e   :  { %4341 = vmatpush3.bf16.msra.mxu1 %v5272_v37 }
 0x57f   :  { %4342 = vmatprep.subr.bf16.mxu1 %v4893_v0 }
 0x582   :  { %4344 = vmatpush3.bf16.msra.mxu1 %v5278_v42 }
 0x583   :  { %4345 = vmatprep.subr.bf16.mxu1 %v4893_v0 }
 0x586   :  { %4347 = vmatpush3.bf16.msra.mxu1 %v5284_v50 }
 0x587   :  { %4348 = vmatprep.subr.bf16.mxu1 %v4893_v0 }
 0x58a   :  { %4350 = vmatpush3.bf16.msra.mxu1 %v5290_v61 }
 0x58b   :  { %4351 = vmatprep.subr.bf16.mxu1 %v4893_v0 }
 0x600   :  { %v1540_v28 = vpop.f32.mrb[12].mxu1 }
 0x601   :  { %v2895_v41 = vmul.f32 -1.442695, %v1540_v28  ;;  %v3374_v2 = vpop.f32.mrb[13].mxu1  ;;  %v1695_v28 = vmax.f32 %v5397_v32, 0.0  ;;  %v426_v32 = vsub.s32 5, %v5170_v16 }
 0x603   :  { %4693 = vpow2.f32 %v2895_v41  ;;  %v427_v43 = vrot.slane %v5176_v19, %v426_v32 }
 0x60d   :  { %v4694_v51 = vpop.eup %4693 }
 0x60e   :  { %v1547_v63 = vadd.f32 1.0, %v4694_v51 }
 0x610   :  { %4695 = vrcp.f32 %v1547_v63 }
 0x61a   :  { %v4696_v53 = vpop.eup %4695 }
 0x61b   :  { %1550 = vst [vmem:[#allocation13 + $0x8] sm:$0xff] %v4696_v53 }
 0x620   :  { %v1617_v35 = vpop.f32.mrb[10].mxu1 }
 0x621   :  { %v1696_v10 = vmax.f32 %v1617_v35, 0.0  ;;  %v5480_v25 = vpop.f32.mrb[11].mxu1 }
 0x623   :  { %3408 = vmatmul.mubr.f32.vlgmr.msra.gmra.mrb[12].mxu0 %v1696_v10 }
 0x624   :  { %4241 = vmatpush3.bf16.msra.mxu0 %v5299_v27  ;;  %3442 = vmatprep.mubr.msk.f32.mxu0 %vm4894_vm0, %v5767_v49 }
 0x625   :  { %4242 = vmatprep.subr.bf16.mxu0 %v4893_v0 }
 0x628   :  { %4244 = vmatpush3.bf16.msra.mxu0 %v5304_v47 }
 0x629   :  { %4245 = vmatprep.subr.bf16.mxu0 %v4893_v0 }
 0x62c   :  { %4247 = vmatpush3.bf16.msra.mxu0 %v5310_v57 }
 0x62d   :  { %4248 = vmatprep.subr.bf16.mxu0 %v4893_v0 }
 0x630   :  { %4250 = vmatpush3.bf16.msra.mxu0 %v5314_v15 }
 0x631   :  { %4251 = vmatprep.subr.bf16.mxu0 %v4893_v0 }
 0x634   :  { %4253 = vmatpush3.bf16.msra.mxu0 %v5318_v40 }
 0x635   :  { %4254 = vmatprep.subr.bf16.mxu0 %v4893_v0 }
 0x638   :  { %4256 = vmatpush3.bf16.msra.mxu0 %v5322_v54 }
 0x639   :  { %4257 = vmatprep.subr.bf16.mxu0 %v4893_v0 }
 0x63c   :  { %4259 = vmatpush3.bf16.msra.mxu0 %v5326_v55 }
 0x63d   :  { %4260 = vmatprep.subr.bf16.mxu0 %v4893_v0 }
 0x640   :  { %4262 = vmatpush3.bf16.msra.mxu0 %v5330_v1 }
 0x641   :  { %4264 = vmatprep.subr.bf16.mxu0 %v5050_v3 }
 0x643   :  { %3443 = vmatmul.mubr.f32.vlgmr.msra.gmra.mrb[12].mxu0 %v1695_v28 }
 0x644   :  { %4266 = vmatpush1.bf16.msra.mxu0 %v5058_v22  ;;  %1908 = vmatprep.mubr.f32.mxu0 %v5767_v49 }
 0x645   :  { %4268 = vmatprep.subr.bf16.mxu0 %v5060_v24 }
 0x648   :  { %4270 = vmatpush1.bf16.msra.mxu0 %v5066_v34 }
 0x649   :  { %4272 = vmatprep.subr.bf16.mxu0 %v5069_v36 }
 0x64c   :  { %4274 = vmatpush1.bf16.msra.mxu0 %v5073_v46 }
 0x64d   :  { %4276 = vmatprep.subr.bf16.mxu0 %v5076_v48 }
 0x650   :  { %4278 = vmatpush1.bf16.msra.mxu0 %v5079_v58 }
 0x651   :  { %4280 = vmatprep.subr.bf16.mxu0 %v5082_v60 }
 0x654   :  { %4282 = vmatpush1.bf16.msra.mxu0 %v5085_v9 }
 0x655   :  { %4284 = vmatprep.subr.bf16.mxu0 %v5088_v11 }
 0x658   :  { %4286 = vmatpush1.bf16.msra.mxu0 %v5091_v23 }
 0x659   :  { %4288 = vmatprep.subr.bf16.mxu0 %v5094_v26 }
 0x65c   :  { %4290 = vmatpush1.bf16.msra.mxu0 %v5097_v33 }
 0x65d   :  { %4292 = vmatprep.subr.bf16.mxu0 %v5151_v59 }
 0x660   :  { %4294 = vmatpush1.bf16.msra.mxu0 %v5153_v4 }
 0x661   :  { %4408 = vmatprep.subr.bf16.mxu0 %v5112_v6 }
 0x663   :  { %1909 = vmatmul.mubr.f32.vlgmr.msra.gmra.mrb[10].mxu0 %v726_v31  ;;  %v5770_v31 = vld [vmem:[#allocation19_spill] sm:$0xff] }
 0x664   :  { %4410 = vmatpush1.bf16.msra.mxu0 %v5114_v13  ;;  %2272 = vmatprep.mubr.f32.mxu0 %v5767_v49  ;;  %v5537_v41 = vadd.f32 %v5770_v31, %v427_v43 }
 0x665   :  { %4412 = vmatprep.subr.bf16.mxu0 %v5117_v14 }
 0x666   :  { %v727_v2 = vmax.f32 %v5537_v41, 0.0 }
 0x668   :  { %4414 = vmatpush1.bf16.msra.mxu0 %v5121_v20 }
 0x669   :  { %4416 = vmatprep.subr.bf16.mxu0 %v5125_v21 }
 0x66c   :  { %4418 = vmatpush1.bf16.msra.mxu0 %v5128_v30 }
 0x66d   :  { %4420 = vmatprep.subr.bf16.mxu0 %v5131_v17 }
 0x670   :  { %4422 = vmatpush1.bf16.msra.mxu0 %v5134_v38 }
 0x671   :  { %4424 = vmatprep.subr.bf16.mxu0 %v5137_v39 }
 0x674   :  { %4426 = vmatpush1.bf16.msra.mxu0 %v5140_v44 }
 0x675   :  { %4428 = vmatprep.subr.bf16.mxu0 %v5143_v45 }
 0x678   :  { %4430 = vmatpush1.bf16.msra.mxu0 %v5146_v52 }
 0x679   :  { %4432 = vmatprep.subr.bf16.mxu0 %v5149_v56 }
 0x67c   :  { %4434 = vmatpush1.bf16.msra.mxu0 %v5157_v5 }
 0x67d   :  { %4436 = vmatprep.subr.bf16.mxu0 %v5161_v7 }
 0x680   :  { %4438 = vmatpush1.bf16.msra.mxu0 %v5165_v12 }
 0x681   :  { %4439 = vmatprep.subr.bf16.mxu0 %v4893_v0 }
 0x683   :  { %2273 = vmatmul.mubr.f32.vlgmr.msra.gmra.mrb[14].mxu0 %v727_v2 }
 0x684   :  { %4441 = vmatpush3.bf16.msra.mxu0 %v5251_v62  ;;  %3547 = vmatprep.mubr.msk.f32.mxu0 %vm4894_vm0, %v5767_v49 }
 0x685   :  { %4442 = vmatprep.subr.bf16.mxu0 %v4893_v0 }
 0x688   :  { %4444 = vmatpush3.bf16.msra.mxu0 %v5254_v8 }
 0x689   :  { %4445 = vmatprep.subr.bf16.mxu0 %v4893_v0 }
 0x68c   :  { %4447 = vmatpush3.bf16.msra.mxu0 %v5260_v18 }
 0x68d   :  { %4448 = vmatprep.subr.bf16.mxu0 %v4893_v0 }
 0x690   :  { %4450 = vmatpush3.bf16.msra.mxu0 %v5266_v29 }
 0x691   :  { %4451 = vmatprep.subr.bf16.mxu0 %v4893_v0 }
 0x694   :  { %4453 = vmatpush3.bf16.msra.mxu0 %v5272_v37 }
 0x695   :  { %4454 = vmatprep.subr.bf16.mxu0 %v4893_v0 }
 0x698   :  { %4456 = vmatpush3.bf16.msra.mxu0 %v5278_v42 }
 0x699   :  { %4457 = vmatprep.subr.bf16.mxu0 %v4893_v0 }
 0x69c   :  { %4459 = vmatpush3.bf16.msra.mxu0 %v5284_v50 }
 0x69d   :  { %4460 = vmatprep.subr.bf16.mxu0 %v4893_v0 }
 0x6a0   :  { %4462 = vmatpush3.bf16.msra.mxu0 %v5290_v61 }
 0x6a1   :  { %4463 = vmatprep.subr.bf16.mxu0 %v4893_v0 }
 0x716   :  { %v1833_v51 = vpop.f32.mrb[12].mxu0 }
 0x717   :  { %v2896_v63 = vmul.f32 -1.442695, %v1833_v51  ;;  %v3444_v53 = vpop.f32.mrb[13].mxu0  ;;  %v1988_v51 = vmax.f32 %v5480_v25, 0.0 }
 0x719   :  { %4697 = vpow2.f32 %v2896_v63 }
 0x723   :  { %v4698_v35 = vpop.eup %4697 }
 0x724   :  { %v1840_v10 = vadd.f32 1.0, %v4698_v35 }
 0x726   :  { %4699 = vrcp.f32 %v1840_v10 }
 0x730   :  { %v4700_v28 = vpop.eup %4699 }
 0x731   :  { %1843 = vst [vmem:[#allocation13 + $0x10] sm:$0xff] %v4700_v28 }
 0x736   :  { %v1910_v32 = vpop.f32.mrb[10].mxu0 }
 0x737   :  { %v1989_v43 = vmax.f32 %v1910_v32, 0.0  ;;  %v5563_v31 = vpop.f32.mrb[11].mxu0 }
 0x739   :  { %3478 = vmatmul.mubr.f32.vlgmr.msra.gmra.mrb[16].mxu1 %v1989_v43 }
 0x73a   :  { %4353 = vmatpush3.bf16.msra.mxu1 %v5299_v27  ;;  %3512 = vmatprep.mubr.msk.f32.mxu1 %vm4894_vm0, %v5767_v49 }
 0x73b   :  { %4354 = vmatprep.subr.bf16.mxu1 %v4893_v0 }
 0x73e   :  { %4356 = vmatpush3.bf16.msra.mxu1 %v5304_v47 }
 0x73f   :  { %4357 = vmatprep.subr.bf16.mxu1 %v4893_v0 }
 0x742   :  { %4359 = vmatpush3.bf16.msra.mxu1 %v5310_v57 }
 0x743   :  { %4360 = vmatprep.subr.bf16.mxu1 %v4893_v0 }
 0x746   :  { %4362 = vmatpush3.bf16.msra.mxu1 %v5314_v15 }
 0x747   :  { %4363 = vmatprep.subr.bf16.mxu1 %v4893_v0 }
 0x74a   :  { %4365 = vmatpush3.bf16.msra.mxu1 %v5318_v40 }
 0x74b   :  { %4366 = vmatprep.subr.bf16.mxu1 %v4893_v0 }
 0x74e   :  { %4368 = vmatpush3.bf16.msra.mxu1 %v5322_v54 }
 0x74f   :  { %4369 = vmatprep.subr.bf16.mxu1 %v4893_v0 }
 0x752   :  { %4371 = vmatpush3.bf16.msra.mxu1 %v5326_v55 }
 0x753   :  { %4372 = vmatprep.subr.bf16.mxu1 %v4893_v0 }
 0x756   :  { %4374 = vmatpush3.bf16.msra.mxu1 %v5330_v1 }
 0x757   :  { %4376 = vmatprep.subr.bf16.mxu1 %v5050_v3 }
 0x759   :  { %3513 = vmatmul.mubr.f32.vlgmr.msra.gmra.mrb[16].mxu1 %v1988_v51 }
 0x75a   :  { %4378 = vmatpush1.bf16.msra.mxu1 %v5058_v22  ;;  %2201 = vmatprep.mubr.f32.mxu1 %v5767_v49 }
 0x75b   :  { %4380 = vmatprep.subr.bf16.mxu1 %v5060_v24 }
 0x75e   :  { %4382 = vmatpush1.bf16.msra.mxu1 %v5066_v34 }
 0x75f   :  { %4384 = vmatprep.subr.bf16.mxu1 %v5069_v36 }
 0x762   :  { %4386 = vmatpush1.bf16.msra.mxu1 %v5073_v46 }
 0x763   :  { %4388 = vmatprep.subr.bf16.mxu1 %v5076_v48 }
 0x766   :  { %4390 = vmatpush1.bf16.msra.mxu1 %v5079_v58 }
 0x767   :  { %4392 = vmatprep.subr.bf16.mxu1 %v5082_v60 }
 0x76a   :  { %4394 = vmatpush1.bf16.msra.mxu1 %v5085_v9 }
 0x76b   :  { %4396 = vmatprep.subr.bf16.mxu1 %v5088_v11 }
 0x76e   :  { %4398 = vmatpush1.bf16.msra.mxu1 %v5091_v23 }
 0x76f   :  { %4400 = vmatprep.subr.bf16.mxu1 %v5094_v26 }
 0x772   :  { %4402 = vmatpush1.bf16.msra.mxu1 %v5097_v33 }
 0x773   :  { %4404 = vmatprep.subr.bf16.mxu1 %v5151_v59 }
 0x776   :  { %4406 = vmatpush1.bf16.msra.mxu1 %v5153_v4 }
 0x777   :  { %4520 = vmatprep.subr.bf16.mxu1 %v5112_v6  ;;  %v430_v6 = vsub.s32 6, %v5170_v16 }
 0x779   :  { %2202 = vmatmul.mubr.f32.vlgmr.msra.gmra.mrb[14].mxu1 %v727_v2 }
 0x77a   :  { %4522 = vmatpush1.bf16.msra.mxu1 %v5114_v13  ;;  %2565 = vmatprep.mubr.f32.mxu1 %v5767_v49  ;;  %v431_v13 = vrot.slane %v5176_v19, %v430_v6 }
 0x77b   :  { %4524 = vmatprep.subr.bf16.mxu1 %v5117_v14  ;;  %v5771_v14 = vld [vmem:[#allocation20_spill] sm:$0xff] }
 0x77e   :  { %4526 = vmatpush1.bf16.msra.mxu1 %v5121_v20  ;;  %v5620_v20 = vadd.f32 %v5771_v14, %v431_v13 }
 0x77f   :  { %4528 = vmatprep.subr.bf16.mxu1 %v5125_v21 }
 0x780   :  { %v728_v21 = vmax.f32 %v5620_v20, 0.0 }
 0x782   :  { %4530 = vmatpush1.bf16.msra.mxu1 %v5128_v30 }
 0x783   :  { %4532 = vmatprep.subr.bf16.mxu1 %v5131_v17 }
 0x786   :  { %4534 = vmatpush1.bf16.msra.mxu1 %v5134_v38 }
 0x787   :  { %4536 = vmatprep.subr.bf16.mxu1 %v5137_v39 }
 0x78a   :  { %4538 = vmatpush1.bf16.msra.mxu1 %v5140_v44 }
 0x78b   :  { %4540 = vmatprep.subr.bf16.mxu1 %v5143_v45 }
 0x78e   :  { %4542 = vmatpush1.bf16.msra.mxu1 %v5146_v52 }
 0x78f   :  { %4544 = vmatprep.subr.bf16.mxu1 %v5149_v56 }
 0x792   :  { %4546 = vmatpush1.bf16.msra.mxu1 %v5157_v5 }
 0x793   :  { %4548 = vmatprep.subr.bf16.mxu1 %v5161_v7 }
 0x796   :  { %4550 = vmatpush1.bf16.msra.mxu1 %v5165_v12  ;;  %v2281_v12 = vmax.f32 %v5563_v31, 0.0 }
 0x797   :  { %4551 = vmatprep.subr.bf16.mxu1 %v4893_v0 }
 0x799   :  { %2566 = vmatmul.mubr.f32.vlgmr.msra.gmra.mrb[18].mxu1 %v728_v21 }
 0x79a   :  { %4553 = vmatpush3.bf16.msra.mxu1 %v5251_v62  ;;  %3617 = vmatprep.mubr.msk.f32.mxu1 %vm4894_vm0, %v5767_v49 }
 0x79b   :  { %4554 = vmatprep.subr.bf16.mxu1 %v4893_v0 }
 0x79e   :  { %4556 = vmatpush3.bf16.msra.mxu1 %v5254_v8 }
 0x79f   :  { %4557 = vmatprep.subr.bf16.mxu1 %v4893_v0 }
 0x7a2   :  { %4559 = vmatpush3.bf16.msra.mxu1 %v5260_v18 }
 0x7a3   :  { %4560 = vmatprep.subr.bf16.mxu1 %v4893_v0 }
 0x7a6   :  { %4562 = vmatpush3.bf16.msra.mxu1 %v5266_v29 }
 0x7a7   :  { %4563 = vmatprep.subr.bf16.mxu1 %v4893_v0 }
 0x7aa   :  { %4565 = vmatpush3.bf16.msra.mxu1 %v5272_v37 }
 0x7ab   :  { %4566 = vmatprep.subr.bf16.mxu1 %v4893_v0 }
 0x7ae   :  { %4568 = vmatpush3.bf16.msra.mxu1 %v5278_v42 }
 0x7af   :  { %4569 = vmatprep.subr.bf16.mxu1 %v4893_v0 }
 0x7b2   :  { %4571 = vmatpush3.bf16.msra.mxu1 %v5284_v50 }
 0x7b3   :  { %4572 = vmatprep.subr.bf16.mxu1 %v4893_v0 }
 0x7b6   :  { %4574 = vmatpush3.bf16.msra.mxu1 %v5290_v61 }
 0x7b7   :  { %4575 = vmatprep.subr.bf16.mxu1 %v4893_v0 }
 0x82c   :  { %v2126_v30 = vpop.f32.mrb[16].mxu1 }
 0x82d   :  { %v2897_v17 = vmul.f32 -1.442695, %v2126_v30  ;;  %v3514_v38 = vpop.f32.mrb[17].mxu1 }
 0x82f   :  { %4701 = vpow2.f32 %v2897_v17 }
 0x839   :  { %v4702_v39 = vpop.eup %4701 }
 0x83a   :  { %v2133_v44 = vadd.f32 1.0, %v4702_v39 }
 0x83c   :  { %4703 = vrcp.f32 %v2133_v44 }
 0x846   :  { %v4704_v45 = vpop.eup %4703 }
 0x847   :  { %2136 = vst [vmem:[#allocation13 + $0x18] sm:$0xff] %v4704_v45 }
 0x84c   :  { %v2203_v52 = vpop.f32.mrb[14].mxu1 }
 0x84d   :  { %v2282_v56 = vmax.f32 %v2203_v52, 0.0  ;;  %v5646_v5 = vpop.f32.mrb[15].mxu1 }
 0x84f   :  { %3548 = vmatmul.mubr.f32.vlgmr.msra.gmra.mrb[16].mxu0 %v2282_v56 }
 0x850   :  { %4465 = vmatpush3.bf16.msra.mxu0 %v5299_v27  ;;  %3582 = vmatprep.mubr.msk.f32.mxu0 %vm4894_vm0, %v5767_v49 }
 0x851   :  { %4466 = vmatprep.subr.bf16.mxu0 %v4893_v0 }
 0x854   :  { %4468 = vmatpush3.bf16.msra.mxu0 %v5304_v47 }
 0x855   :  { %4469 = vmatprep.subr.bf16.mxu0 %v4893_v0 }
 0x858   :  { %4471 = vmatpush3.bf16.msra.mxu0 %v5310_v57 }
 0x859   :  { %4472 = vmatprep.subr.bf16.mxu0 %v4893_v0 }
 0x85c   :  { %4474 = vmatpush3.bf16.msra.mxu0 %v5314_v15 }
 0x85d   :  { %4475 = vmatprep.subr.bf16.mxu0 %v4893_v0 }
 0x860   :  { %4477 = vmatpush3.bf16.msra.mxu0 %v5318_v40 }
 0x861   :  { %4478 = vmatprep.subr.bf16.mxu0 %v4893_v0 }
 0x864   :  { %4480 = vmatpush3.bf16.msra.mxu0 %v5322_v54 }
 0x865   :  { %4481 = vmatprep.subr.bf16.mxu0 %v4893_v0 }
 0x868   :  { %4483 = vmatpush3.bf16.msra.mxu0 %v5326_v55 }
 0x869   :  { %4484 = vmatprep.subr.bf16.mxu0 %v4893_v0 }
 0x86c   :  { %4486 = vmatpush3.bf16.msra.mxu0 %v5330_v1  ;;  %v2567_v7 = vpop.f32.mrb[18].mxu1 }
 0x86d   :  { %v2569_v16 = vpop.f32.mrb[19].mxu1  ;;  %4488 = vmatprep.subr.bf16.mxu0 %v5050_v3  ;;  %v2724_v3 = vmax.f32 %v2567_v7, 0.0 }
 0x86f   :  { %3583 = vmatmul.mubr.f32.vlgmr.msra.gmra.mrb[16].mxu0 %v2281_v12 }
 0x870   :  { %4490 = vmatpush1.bf16.msra.mxu0 %v5058_v22  ;;  %2494 = vmatprep.mubr.f32.mxu0 %v5767_v49 }
 0x871   :  { %4492 = vmatprep.subr.bf16.mxu0 %v5060_v24 }
 0x874   :  { %4494 = vmatpush1.bf16.msra.mxu0 %v5066_v34 }
 0x875   :  { %4496 = vmatprep.subr.bf16.mxu0 %v5069_v36 }
 0x878   :  { %4498 = vmatpush1.bf16.msra.mxu0 %v5073_v46 }
 0x879   :  { %4500 = vmatprep.subr.bf16.mxu0 %v5076_v48 }
 0x87c   :  { %4502 = vmatpush1.bf16.msra.mxu0 %v5079_v58 }
 0x87d   :  { %4504 = vmatprep.subr.bf16.mxu0 %v5082_v60 }
 0x880   :  { %4506 = vmatpush1.bf16.msra.mxu0 %v5085_v9 }
 0x881   :  { %4508 = vmatprep.subr.bf16.mxu0 %v5088_v11 }
 0x884   :  { %4510 = vmatpush1.bf16.msra.mxu0 %v5091_v23  ;;  %v2573_v23 = vmax.f32 %v5646_v5, 0.0 }
 0x885   :  { %4512 = vmatprep.subr.bf16.mxu0 %v5094_v26 }
 0x888   :  { %4514 = vmatpush1.bf16.msra.mxu0 %v5097_v33 }
 0x889   :  { %4516 = vmatprep.subr.bf16.mxu0 %v5151_v59 }
 0x88c   :  { %4518 = vmatpush1.bf16.msra.mxu0 %v5153_v4 }
 0x88d   :  { %4599 = vmatprep.subr.bf16.mxu0 %v4893_v0 }
 0x88f   :  { %2495 = vmatmul.mubr.f32.vlgmr.msra.gmra.mrb[14].mxu0 %v728_v21 }
 0x890   :  { %4601 = vmatpush3.bf16.msra.mxu0 %v5251_v62  ;;  %3687 = vmatprep.mubr.msk.f32.mxu0 %vm4894_vm0, %v5767_v49 }
 0x891   :  { %4602 = vmatprep.subr.bf16.mxu0 %v4893_v0 }
 0x894   :  { %4604 = vmatpush3.bf16.msra.mxu0 %v5254_v8 }
 0x895   :  { %4605 = vmatprep.subr.bf16.mxu0 %v4893_v0 }
 0x898   :  { %4607 = vmatpush3.bf16.msra.mxu0 %v5260_v18 }
 0x899   :  { %4608 = vmatprep.subr.bf16.mxu0 %v4893_v0 }
 0x89c   :  { %4610 = vmatpush3.bf16.msra.mxu0 %v5266_v29 }
 0x89d   :  { %4611 = vmatprep.subr.bf16.mxu0 %v4893_v0 }
 0x8a0   :  { %4613 = vmatpush3.bf16.msra.mxu0 %v5272_v37 }
 0x8a1   :  { %4614 = vmatprep.subr.bf16.mxu0 %v4893_v0 }
 0x8a4   :  { %4616 = vmatpush3.bf16.msra.mxu0 %v5278_v42 }
 0x8a5   :  { %4617 = vmatprep.subr.bf16.mxu0 %v4893_v0 }
 0x8a8   :  { %4619 = vmatpush3.bf16.msra.mxu0 %v5284_v50 }
 0x8a9   :  { %4620 = vmatprep.subr.bf16.mxu0 %v4893_v0 }
 0x8ac   :  { %4622 = vmatpush3.bf16.msra.mxu0 %v5290_v61 }
 0x8ad   :  { %4623 = vmatprep.subr.bf16.mxu0 %v4893_v0 }
 0x8af   :  { %3688 = vmatmul.mubr.f32.vlgmr.msra.gmra.mrb[18].mxu0 %v2724_v3 }
 0x8b0   :  { %4625 = vmatpush3.bf16.msra.mxu0 %v5299_v27  ;;  %3722 = vmatprep.mubr.msk.f32.mxu0 %vm4894_vm0, %v5767_v49 }
 0x8b1   :  { %4626 = vmatprep.subr.bf16.mxu0 %v4893_v0 }
 0x8b4   :  { %4628 = vmatpush3.bf16.msra.mxu0 %v5304_v47 }
 0x8b5   :  { %4629 = vmatprep.subr.bf16.mxu0 %v4893_v0 }
 0x8b8   :  { %4631 = vmatpush3.bf16.msra.mxu0 %v5310_v57 }
 0x8b9   :  { %4632 = vmatprep.subr.bf16.mxu0 %v4893_v0 }
 0x8bc   :  { %4634 = vmatpush3.bf16.msra.mxu0 %v5314_v15 }
 0x8bd   :  { %4635 = vmatprep.subr.bf16.mxu0 %v4893_v0 }
 0x8c0   :  { %4637 = vmatpush3.bf16.msra.mxu0 %v5318_v40 }
 0x8c1   :  { %4638 = vmatprep.subr.bf16.mxu0 %v4893_v0 }
 0x8c4   :  { %4640 = vmatpush3.bf16.msra.mxu0 %v5322_v54 }
 0x8c5   :  { %4641 = vmatprep.subr.bf16.mxu0 %v4893_v0 }
 0x8c8   :  { %4643 = vmatpush3.bf16.msra.mxu0 %v5326_v55 }
 0x8c9   :  { %4644 = vmatprep.subr.bf16.mxu0 %v4893_v0 }
 0x8cc   :  { %4646 = vmatpush3.bf16.msra.mxu0 %v5330_v1 }
 0x942   :  { %v2419_v22 = vpop.f32.mrb[16].mxu0 }
 0x943   :  { %v2898_v24 = vmul.f32 -1.442695, %v2419_v22  ;;  %v3584_v34 = vpop.f32.mrb[17].mxu0 }
 0x945   :  { %4705 = vpow2.f32 %v2898_v24 }
 0x94f   :  { %v4706_v36 = vpop.eup %4705 }
 0x950   :  { %v2426_v46 = vadd.f32 1.0, %v4706_v36 }
 0x952   :  { %4707 = vrcp.f32 %v2426_v46 }
 0x95c   :  { %v4708_v48 = vpop.eup %4707 }
 0x95d   :  { %2429 = vst [vmem:[#allocation13 + $0x20] sm:$0xff] %v4708_v48 }
 0x962   :  { %v2496_v58 = vpop.f32.mrb[14].mxu0 }
 0x963   :  { %v2574_v60 = vmax.f32 %v2496_v58, 0.0  ;;  %v2498_v9 = vpop.f32.mrb[15].mxu0 }
 0x964   :  { %v2723_v11 = vmax.f32 %v2498_v9, 0.0 }
 0x965   :  { %3618 = vmatmul.mubr.f32.vlgmr.msra.gmra.mrb[20].mxu1 %v2574_v60 }
 0x966   :  { %4577 = vmatpush3.bf16.msra.mxu1 %v5299_v27  ;;  %3723 = vmatmul.mubr.f32.vlgmr.msra.gmra.mrb[18].mxu0 %v2723_v11 }
 0x967   :  { %4578 = vmatprep.subr.bf16.mxu1 %v4893_v0  ;;  %3652 = vmatprep.mubr.msk.f32.mxu1 %vm4894_vm0, %v5767_v49 }
 0x96a   :  { %4580 = vmatpush3.bf16.msra.mxu1 %v5304_v47 }
 0x96b   :  { %4581 = vmatprep.subr.bf16.mxu1 %v4893_v0 }
 0x96e   :  { %4583 = vmatpush3.bf16.msra.mxu1 %v5310_v57 }
 0x96f   :  { %4584 = vmatprep.subr.bf16.mxu1 %v4893_v0 }
 0x972   :  { %4586 = vmatpush3.bf16.msra.mxu1 %v5314_v15 }
 0x973   :  { %4587 = vmatprep.subr.bf16.mxu1 %v4893_v0 }
 0x976   :  { %4589 = vmatpush3.bf16.msra.mxu1 %v5318_v40 }
 0x977   :  { %4590 = vmatprep.subr.bf16.mxu1 %v4893_v0 }
 0x97a   :  { %4592 = vmatpush3.bf16.msra.mxu1 %v5322_v54 }
 0x97b   :  { %4593 = vmatprep.subr.bf16.mxu1 %v4893_v0 }
 0x97e   :  { %4595 = vmatpush3.bf16.msra.mxu1 %v5326_v55 }
 0x97f   :  { %4596 = vmatprep.subr.bf16.mxu1 %v4893_v0 }
 0x982   :  { %4598 = vmatpush3.bf16.msra.mxu1 %v5330_v1 }
 0x985   :  { %3653 = vmatmul.mubr.f32.vlgmr.msra.gmra.mrb[20].mxu1 %v2573_v23 }
 0xa39   :  { %v2861_v26 = vpop.f32.mrb[18].mxu0 }
 0xa3a   :  { %v2900_v33 = vmul.f32 -1.442695, %v2861_v26  ;;  %v3724_v59 = vpop.f32.mrb[19].mxu0 }
 0xa3c   :  { %4709 = vpow2.f32 %v2900_v33 }
 0xa46   :  { %v4710_v4 = vpop.eup %4709 }
 0xa47   :  { %v2868_v19 = vadd.f32 1.0, %v4710_v4 }
 0xa49   :  { %4711 = vrcp.f32 %v2868_v19 }
 0xa53   :  { %v4712_v62 = vpop.eup %4711 }
 0xa54   :  { %2871 = vst [vmem:[#allocation13 + $0x30] sm:$0xff] %v4712_v62 }
 0xa58   :  { %v2711_v8 = vpop.f32.mrb[20].mxu1 }
 0xa59   :  { %v2899_v18 = vmul.f32 -1.442695, %v2711_v8  ;;  %v3654_v29 = vpop.f32.mrb[21].mxu1 }
 0xa5b   :  { %4713 = vpow2.f32 %v2899_v18 }
 0xa65   :  { %v4714_v55 = vpop.eup %4713 }
 0xa66   :  { %v2718_v0 = vadd.f32 1.0, %v4714_v55 }
 0xa68   :  { %4715 = vrcp.f32 %v2718_v0 }
 0xa72   :  { %v4716_v1 = vpop.eup %4715 }
 0xa73   :  { %2721 = vst [vmem:[#allocation13 + $0x28] sm:$0xff] %v4716_v1 }
 0xa74   :  { %4860 = shalt.err (!%p4857_p10)
}
 0xa75   :  { %s4861_s28 = scalar_lea.hbm %s5760_s9, 896 }
 0xa76   :  { %p4862_p11 = scmp.ne.s32.totalorder %s5760_s9, %s4861_s28  ;;  %p4865_p12 = scmp.lt.u32.totalorder %s4861_s28, %s5760_s9 }
 0xa78   :  { %p4867_p13 = pnand %p4865_p12, %p4862_p11 }
 0xa7a   :  { %4870 = shalt.err (!%p4867_p13)
}
 0xa7b   :  { %2881 = dma.vmem_to_hbm [thread:$0]  %s2879_s23, 896, %s5760_s9, [#allocation4]  }
 0xa7c   :  { %4879 = dma.done.wait [#allocation4], 896  }
 0xa7d   :  { %4880 = vsyncadd [#allocation4], 4294966400 }
 0xa7e   :  { %2885 = vsyncpa [#allocation3], 1 }
 0xa7f   :  { %2886 = vsyncpa [#allocation6], 1 }
 0xa80   :  { %2887 = vsyncpa [#allocation9], 1 }
 0xa81   :  { %2888 = vsyncpa [#allocation12], 1 }
 0xa82   :  { %2889 = vsyncpa [#allocation4], 1 }

</bundles_post_ra>
